<compile_context>
chip_gen: v6e
topology: v6e:2x2x1
jax: 0.10.0
libtpu: 0.0.40
codegen_flags: <defaults>
</compile_context>

<pallas_src>
import functools

import jax
import jax.numpy as jnp
from jax import lax
from jax.experimental import pallas as pl
from jax.experimental.pallas import tpu as pltpu

_LANE = 128
_H1, _H2, _H3 = 1024, 512, 256


def _round_up(n, m):
    return (n + m - 1) // m * m


def _leaky_relu(x, slope=0.2):
    return jnp.where(x > 0, x, slope * x)


def _disc_kernel(x_ref,
                 w1_ref, b1_ref,
                 w2_ref, b2_ref,
                 w3_ref, b3_ref,
                 w4t_ref, b4_ref,
                 o_ref,
                 acc_ref):
    """Fused 4-layer MLP + LeakyReLU + Sigmoid.

    Grid = (batch_tiles, k_tiles). Layer 1 accumulates over the k axis into acc_ref (f32);
    layers 2..4 + sigmoid run on the last k step only. When k_tiles == 1 this degenerates
    to a single fully fused pass. Layer 2..4 weights + biases are whole-array resident in
    VMEM and reused across all batch tiles. bf16 MXU operands, f32 accumulation.
    """
    k = pl.program_id(1)

    @pl.when(k == 0)
    def _():
        acc_ref[...] = jnp.zeros_like(acc_ref)

    # Layer 1 partial: (TB, TK) x (TK, 1024); x cast to bf16 on the fly.
    x = x_ref[...].astype(jnp.bfloat16)
    acc_ref[...] += jnp.dot(x, w1_ref[...], preferred_element_type=jnp.float32)

    @pl.when(k == pl.num_programs(1) - 1)
    def _():
        # Dropout(0.3) == identity in eval mode.
        h = _leaky_relu(acc_ref[...] + b1_ref[...])
        h = _leaky_relu(jnp.dot(h.astype(jnp.bfloat16), w2_ref[...],
                                preferred_element_type=jnp.float32) + b2_ref[...])
        h = _leaky_relu(jnp.dot(h.astype(jnp.bfloat16), w3_ref[...],
                                preferred_element_type=jnp.float32) + b3_ref[...])
        # Final layer as (1, 256) x (TB, 256)^T -> (1, TB): lane-dense output row.
        logits = lax.dot_general(
            w4t_ref[...], h.astype(jnp.bfloat16),
            dimension_numbers=(((1,), (1,)), ((), ())),
            preferred_element_type=jnp.float32) + b4_ref[...]
        # Sigmoid: exp + exact reciprocal, both on the otherwise-idle EUP.
        o_ref[...] = pl.reciprocal(1.0 + jnp.exp(-logits), approx=False).astype(o_ref.dtype)


def _large_batch_tile():
    """Batch-tile target for the large-batch path (256 on v4/v5*, 512 on v6e/v7x)."""
    try:
        kind = jax.devices()[0].device_kind.lower()
        if "v4" in kind or "v5" in kind:
            return 256
    except Exception:
        pass
    return 512


@functools.partial(jax.jit, static_argnames=("image_size", "batch_tile", "k_tile"))
def discriminator_forward(x, params, *, image_size, batch_tile=None, k_tile=None):
    """x: (B, 1, H, W), (B, H, W) or (B, F). Returns (B, 1) float32."""
    B = x.shape[0]
    F = image_size * image_size
    x2d = x.reshape(B, -1)
    assert x2d.shape[1] == F, "flattened feature dim must equal image_size**2"

    (w1, b1), (w2, b2), (w3, b3), (w4, b4) = params
    # bf16 MXU operands (no-op if params already stored in bf16); f32 biases.
    w1, w2, w3 = (w.astype(jnp.bfloat16) for w in (w1, w2, w3))
    w4t = w4.astype(jnp.bfloat16).reshape(_H3, 1).T                 # (1, 256)
    b1, b2, b3, b4 = (b.astype(jnp.float32).reshape(1, -1) for b in (b1, b2, b3, b4))

    # ---- tile selection ------------------------------------------------------------
    # Batch tile: big, lane-aligned tiles for large batches (amortize grid-step overhead);
    # tiny batches padded up to a sublane/bf16-pack friendly tile.
    if batch_tile is not None:
        TB = batch_tile
    elif B > 128:
        TB = min(_large_batch_tile(), _round_up(B, _LANE))
    else:
        TB = _round_up(max(B, 8), 16)
    Bp = _round_up(B, TB)
    n_b = Bp // TB

    # Feature (K) tiling: keep W1 whole-array in VMEM unless the resident footprint would
    # threaten the v7x 64 MiB/TC budget, in which case K-tile layer 1.
    rest_resident = (_H1 * _H2 + _H2 * _H3 + _H3) * 2 + (_H1 + _H2 + _H3 + 1) * 4
    w1_resident = _round_up(F, _LANE) * _H1 * 2
    if k_tile is not None:
        TK = k_tile
    elif w1_resident + rest_resident > (36 << 20):
        TK = 512
    else:
        TK = _round_up(F, _LANE)
    Fp = _round_up(F, TK)
    n_k = Fp // TK

    # Pad only when needed (skips the wrapper-side HBM round trip for aligned shapes);
    # x keeps its input dtype -- the kernel casts to bf16 on the fly.
    if Bp != B or Fp != F:
        x2d = jnp.pad(x2d, ((0, Bp - B), (0, Fp - F)))
    if w1.shape[0] != Fp:
        w1 = jnp.pad(w1, ((0, Fp - w1.shape[0]), (0, 0)))

    # ---- specs ---------------------------------------------------------------------
    vmem_full = pl.BlockSpec(memory_space=pltpu.MemorySpace.VMEM)
    w1_spec = vmem_full if n_k == 1 else pl.BlockSpec((TK, _H1), lambda i, k: (k, 0))
    in_specs = [
        pl.BlockSpec((TB, TK), lambda i, k: (i, k)),   # x tile (pipelined)
        w1_spec, vmem_full,                            # w1, b1
        vmem_full, vmem_full,                          # w2, b2
        vmem_full, vmem_full,                          # w3, b3
        vmem_full, vmem_full,                          # w4^T, b4
    ]
    out_spec = pl.BlockSpec((1, TB), lambda i, k: (0, i))   # lane-dense output rows

    # ---- cost estimate + VMEM budget -------------------------------------------------
    flops = 2 * Bp * (Fp * _H1 + _H1 * _H2 + _H2 * _H3 + _H3)
    w1_bytes = w1.size * 2
    other_w_bytes = (w2.size + w3.size + w4t.size) * 2 \
        + (b1.size + b2.size + b3.size + b4.size) * 4
    w1_traffic = w1_bytes * (n_b if n_k > 1 else 1)    # re-streamed per batch tile when K-tiled
    bytes_accessed = int(w1_traffic + other_w_bytes
                         + x2d.size * x2d.dtype.itemsize + Bp * 4)
    cost = pl.CostEstimate(flops=int(flops), transcendentals=int(2 * Bp),
                           bytes_accessed=bytes_accessed)

    x_item = x2d.dtype.itemsize
    resident = (rest_resident
                + (w1_bytes if n_k == 1 else 2 * TK * _H1 * 2)   # whole vs double-buffered tile
                + 2 * TB * TK * x_item + 2 * TB * 4              # double-buffered x / out tiles
                + TB * _H1 * 4                                   # f32 accumulator scratch
                + TB * (_H1 + _H2 + _H3) * 4)                    # f32 activation temporaries
    vmem_limit = int(min(56 << 20, max(16 << 20, int(1.4 * resident))))

    out = pl.pallas_call(
        _disc_kernel,
        out_shape=jax.ShapeDtypeStruct((1, Bp), jnp.float32),
        grid_spec=pltpu.PrefetchScalarGridSpec(
            num_scalar_prefetch=0,
            grid=(n_b, n_k),
            in_specs=in_specs,
            out_specs=out_spec,
            scratch_shapes=[pltpu.VMEM((TB, _H1), jnp.float32)],
        ),
        compiler_params=pltpu.CompilerParams(
            # Batch tiles are independent; layer-1 K axis is a reduction (kept last).
            dimension_semantics=("parallel", "arbitrary"),
            vmem_limit_bytes=vmem_limit,
        ),
        cost_estimate=cost,
    )(x2d, w1, b1, w2, b2, w3, b3, w4t, b4)

    return out[0, :B].reshape(B, 1)


def init_params(key, image_size):
    """PyTorch Linear default init U(-1/sqrt(in), 1/sqrt(in)).

    Weights stored (in, out) in bfloat16 (streamed straight to the MXU); biases (1, out) f32.
    """
    F = image_size * image_size
    dims = [(F, _H1), (_H1, _H2), (_H2, _H3), (_H3, 1)]
    params = []
    for (din, dout) in dims:
        key, kw, kb = jax.random.split(key, 3)
        bound = 1.0 / jnp.sqrt(din)
        w = jax.random.uniform(kw, (din, dout), jnp.float32, -bound, bound)
        b = jax.random.uniform(kb, (1, dout), jnp.float32, -bound, bound)
        params.append((w.astype(jnp.bfloat16), b))
    return params


def _reference_forward(x, params, image_size):
    """Pure-JAX reference mirroring the kernel's bf16-operand / f32-accumulate math."""
    h = x.reshape(x.shape[0], -1).astype(jnp.bfloat16)
    for i, (w, b) in enumerate(params):
        h = jnp.dot(h.astype(jnp.bfloat16), w.astype(jnp.bfloat16),
                    preferred_element_type=jnp.float32) + b.astype(jnp.float32).reshape(1, -1)
        if i < 3:
            h = jnp.where(h > 0, h, 0.2 * h)
    return jax.nn.sigmoid(h)


if __name__ == "__main__":
    image_size = 16
    batch = 2

    key = jax.random.PRNGKey(0)
    key, kx = jax.random.split(key)
    x = jax.random.normal(kx, (batch, 1, image_size, image_size), jnp.float32)
    params = init_params(key, image_size)

    # Default (fully fused, W1 resident) path.
    out = discriminator_forward(x, params, image_size=image_size)
    out = jax.block_until_ready(out)
    ref = _reference_forward(x, params, image_size)
    assert out.shape == (batch, 1), out.shape
    assert jnp.allclose(out, ref, atol=5e-3, rtol=5e-3), (out, ref)

    # Multi-batch-tile path (row padding + lane-dense per-tile output rows).
    key, kx2 = jax.random.split(key)
    x2 = jax.random.normal(kx2, (200, 1, image_size, image_size), jnp.float32)
    out2 = jax.block_until_ready(
        discriminator_forward(x2, params, image_size=image_size, batch_tile=128))
    ref2 = _reference_forward(x2, params, image_size)
    assert out2.shape == (200, 1), out2.shape
    assert jnp.allclose(out2, ref2, atol=5e-3, rtol=5e-3)

    # K-tiled layer-1 path (the large-image_size / v7x VMEM-guard fallback).
    out3 = jax.block_until_ready(
        discriminator_forward(x, params, image_size=image_size, k_tile=128))
    assert jnp.allclose(out3, ref, atol=5e-3, rtol=5e-3)

    print("KERNEL_OK")
</pallas_src>

<mosaic_0001>
module attributes {stable_mosaic.version = 11 : i64} {
  func.func @_disc_kernel(%arg0: i32, %arg1: i32, %arg2: memref<16x256xf32, #tpu.memory_space<vmem>>, %arg3: memref<256x1024xbf16, #tpu.memory_space<vmem>>, %arg4: memref<1x1024xf32, #tpu.memory_space<vmem>>, %arg5: memref<1024x512xbf16, #tpu.memory_space<vmem>>, %arg6: memref<1x512xf32, #tpu.memory_space<vmem>>, %arg7: memref<512x256xbf16, #tpu.memory_space<vmem>>, %arg8: memref<1x256xf32, #tpu.memory_space<vmem>>, %arg9: memref<1x256xbf16, #tpu.memory_space<vmem>>, %arg10: memref<1x1xf32, #tpu.memory_space<vmem>>, %arg11: memref<1x16xf32, #tpu.memory_space<vmem>>, %arg12: memref<16x1024xf32, #tpu.memory_space<vmem>>) attributes {dimension_semantics = [#tpu.dimension_semantics<parallel>, #tpu.dimension_semantics<arbitrary>], iteration_bounds = array<i64: 1, 1>, scalar_prefetch = 0 : i64, scratch_operands = 1 : i64, tpu.core_type = #tpu.core_type<tc>, window_params = [{transform_indices = @transform_0, window_bounds = array<i64: 16, 256>}, {pipeline_mode = #tpu.pipeline_mode<synchronous>, transform_indices = @transform_1, window_bounds = array<i64: 256, 1024>}, {pipeline_mode = #tpu.pipeline_mode<synchronous>, transform_indices = @transform_2, window_bounds = array<i64: 1, 1024>}, {pipeline_mode = #tpu.pipeline_mode<synchronous>, transform_indices = @transform_3, window_bounds = array<i64: 1024, 512>}, {pipeline_mode = #tpu.pipeline_mode<synchronous>, transform_indices = @transform_4, window_bounds = array<i64: 1, 512>}, {pipeline_mode = #tpu.pipeline_mode<synchronous>, transform_indices = @transform_5, window_bounds = array<i64: 512, 256>}, {pipeline_mode = #tpu.pipeline_mode<synchronous>, transform_indices = @transform_6, window_bounds = array<i64: 1, 256>}, {pipeline_mode = #tpu.pipeline_mode<synchronous>, transform_indices = @transform_7, window_bounds = array<i64: 1, 256>}, {pipeline_mode = #tpu.pipeline_mode<synchronous>, transform_indices = @transform_8, window_bounds = array<i64: 1, 1>}, {transform_indices = @transform_9, window_bounds = array<i64: 1, 16>}]} {
    %c0_i32 = arith.constant 0 : i32
    %0 = arith.cmpi eq, %arg1, %c0_i32 : i32
    %1 = arith.extui %0 : i1 to i32
    %c0_i32_0 = arith.constant 0 : i32
    %2 = arith.cmpi ne, %1, %c0_i32_0 : i32
    scf.if %2 {
      %cst_10 = arith.constant 0.000000e+00 : f32
      %13 = vector.broadcast %cst_10 : f32 to vector<16x1024xf32>
      %c0_11 = arith.constant 0 : index
      %c0_12 = arith.constant 0 : index
      %14 = vector.load %arg12[%c0_11, %c0_12] : memref<16x1024xf32, #tpu.memory_space<vmem>>, vector<16x1024xf32>
      tpu.vector_store %arg12[%c0_11, %c0_12], %13 {strides = array<i32>} : memref<16x1024xf32, #tpu.memory_space<vmem>>, vector<16x1024xf32>,
    } else {
    }
    %c0 = arith.constant 0 : index
    %c0_1 = arith.constant 0 : index
    %3 = vector.load %arg2[%c0, %c0_1] : memref<16x256xf32, #tpu.memory_space<vmem>>, vector<16x256xf32>
    %4 = arith.truncf %3 : vector<16x256xf32> to vector<16x256xbf16>
    %c0_2 = arith.constant 0 : index
    %c0_3 = arith.constant 0 : index
    %5 = vector.load %arg12[%c0_2, %c0_3] : memref<16x1024xf32, #tpu.memory_space<vmem>>, vector<16x1024xf32>
    %c0_4 = arith.constant 0 : index
    %c0_5 = arith.constant 0 : index
    %6 = vector.load %arg3[%c0_4, %c0_5] : memref<256x1024xbf16, #tpu.memory_space<vmem>>, vector<256x1024xbf16>
    %cst = arith.constant dense<0.000000e+00> : vector<16x1024xf32>
    %7 = tpu.matmul %4, %6, %cst {dimension_numbers = #tpu.dot_dimension_numbers<[1], [0], [0], [1], [0, 0, 1, 1], [], []>} : vector<16x256xbf16>, vector<256x1024xbf16>, vector<16x1024xf32> -> vector<16x1024xf32>
    %8 = arith.addf %5, %7 : vector<16x1024xf32>
    %c0_6 = arith.constant 0 : index
    %c0_7 = arith.constant 0 : index
    %9 = vector.load %arg12[%c0_6, %c0_7] : memref<16x1024xf32, #tpu.memory_space<vmem>>, vector<16x1024xf32>
    tpu.vector_store %arg12[%c0_6, %c0_7], %8 {strides = array<i32>} : memref<16x1024xf32, #tpu.memory_space<vmem>>, vector<16x1024xf32>,
    %c0_i32_8 = arith.constant 0 : i32
    %10 = arith.cmpi eq, %arg1, %c0_i32_8 : i32
    %11 = arith.extui %10 : i1 to i32
    %c0_i32_9 = arith.constant 0 : i32
    %12 = arith.cmpi ne, %11, %c0_i32_9 : i32
    scf.if %12 {
      %c0_10 = arith.constant 0 : index
      %c0_11 = arith.constant 0 : index
      %13 = vector.load %arg12[%c0_10, %c0_11] : memref<16x1024xf32, #tpu.memory_space<vmem>>, vector<16x1024xf32>
      %c0_12 = arith.constant 0 : index
      %c0_13 = arith.constant 0 : index
      %14 = vector.load %arg4[%c0_12, %c0_13] : memref<1x1024xf32, #tpu.memory_space<vmem>>, vector<1x1024xf32>
      %15 = vector.broadcast %14 : vector<1x1024xf32> to vector<16x1024xf32>
      %16 = arith.addf %13, %15 : vector<16x1024xf32>
      %cst_14 = arith.constant 0.000000e+00 : f32
      %17 = vector.broadcast %cst_14 : f32 to vector<16x1024xf32>
      %18 = arith.cmpf ogt, %16, %17 : vector<16x1024xf32>
      %cst_15 = arith.constant 2.000000e-01 : f32
      %19 = vector.broadcast %cst_15 : f32 to vector<16x1024xf32>
      %20 = arith.mulf %19, %16 : vector<16x1024xf32>
      %21 = arith.select %18, %16, %20 : vector<16x1024xi1>, vector<16x1024xf32>
      %22 = arith.truncf %21 : vector<16x1024xf32> to vector<16x1024xbf16>
      %c0_16 = arith.constant 0 : index
      %c0_17 = arith.constant 0 : index
      %23 = vector.load %arg5[%c0_16, %c0_17] : memref<1024x512xbf16, #tpu.memory_space<vmem>>, vector<1024x512xbf16>
      %cst_18 = arith.constant dense<0.000000e+00> : vector<16x512xf32>
      %24 = tpu.matmul %22, %23, %cst_18 {dimension_numbers = #tpu.dot_dimension_numbers<[1], [0], [0], [1], [0, 0, 1, 1], [], []>} : vector<16x1024xbf16>, vector<1024x512xbf16>, vector<16x512xf32> -> vector<16x512xf32>
      %c0_19 = arith.constant 0 : index
      %c0_20 = arith.constant 0 : index
      %25 = vector.load %arg6[%c0_19, %c0_20] : memref<1x512xf32, #tpu.memory_space<vmem>>, vector<1x512xf32>
      %26 = vector.broadcast %25 : vector<1x512xf32> to vector<16x512xf32>
      %27 = arith.addf %24, %26 : vector<16x512xf32>
      %cst_21 = arith.constant 0.000000e+00 : f32
      %28 = vector.broadcast %cst_21 : f32 to vector<16x512xf32>
      %29 = arith.cmpf ogt, %27, %28 : vector<16x512xf32>
      %cst_22 = arith.constant 2.000000e-01 : f32
      %30 = vector.broadcast %cst_22 : f32 to vector<16x512xf32>
      %31 = arith.mulf %30, %27 : vector<16x512xf32>
      %32 = arith.select %29, %27, %31 : vector<16x512xi1>, vector<16x512xf32>
      %33 = arith.truncf %32 : vector<16x512xf32> to vector<16x512xbf16>
      %c0_23 = arith.constant 0 : index
      %c0_24 = arith.constant 0 : index
      %34 = vector.load %arg7[%c0_23, %c0_24] : memref<512x256xbf16, #tpu.memory_space<vmem>>, vector<512x256xbf16>
      %cst_25 = arith.constant dense<0.000000e+00> : vector<16x256xf32>
      %35 = tpu.matmul %33, %34, %cst_25 {dimension_numbers = #tpu.dot_dimension_numbers<[1], [0], [0], [1], [0, 0, 1, 1], [], []>} : vector<16x512xbf16>, vector<512x256xbf16>, vector<16x256xf32> -> vector<16x256xf32>
      %c0_26 = arith.constant 0 : index
      %c0_27 = arith.constant 0 : index
      %36 = vector.load %arg8[%c0_26, %c0_27] : memref<1x256xf32, #tpu.memory_space<vmem>>, vector<1x256xf32>
      %37 = vector.broadcast %36 : vector<1x256xf32> to vector<16x256xf32>
      %38 = arith.addf %35, %37 : vector<16x256xf32>
      %cst_28 = arith.constant 0.000000e+00 : f32
      %39 = vector.broadcast %cst_28 : f32 to vector<16x256xf32>
      %40 = arith.cmpf ogt, %38, %39 : vector<16x256xf32>
      %cst_29 = arith.constant 2.000000e-01 : f32
      %41 = vector.broadcast %cst_29 : f32 to vector<16x256xf32>
      %42 = arith.mulf %41, %38 : vector<16x256xf32>
      %43 = arith.select %40, %38, %42 : vector<16x256xi1>, vector<16x256xf32>
      %c0_30 = arith.constant 0 : index
      %c0_31 = arith.constant 0 : index
      %44 = vector.load %arg9[%c0_30, %c0_31] : memref<1x256xbf16, #tpu.memory_space<vmem>>, vector<1x256xbf16>
      %45 = arith.truncf %43 : vector<16x256xf32> to vector<16x256xbf16>
      %cst_32 = arith.constant dense<0.000000e+00> : vector<1x16xf32>
      %46 = tpu.matmul %44, %45, %cst_32 {dimension_numbers = #tpu.dot_dimension_numbers<[1], [1], [0], [0], [0, 0, 1, 0], [], []>} : vector<1x256xbf16>, vector<16x256xbf16>, vector<1x16xf32> -> vector<1x16xf32>
      %c0_33 = arith.constant 0 : index
      %c0_34 = arith.constant 0 : index
      %47 = vector.load %arg10[%c0_33, %c0_34] : memref<1x1xf32, #tpu.memory_space<vmem>>, vector<1x1xf32>
      %48 = vector.broadcast %47 : vector<1x1xf32> to vector<1x16xf32>
      %49 = arith.addf %46, %48 : vector<1x16xf32>
      %cst_35 = arith.constant 0.000000e+00 : f32
      %50 = vector.broadcast %cst_35 : f32 to vector<1x16xf32>
      %51 = arith.subf %50, %49 : vector<1x16xf32>
      %52 = math.exp %51 : vector<1x16xf32>
      %cst_36 = arith.constant 1.000000e+00 : f32
      %53 = vector.broadcast %cst_36 : f32 to vector<1x16xf32>
      %54 = arith.addf %53, %52 : vector<1x16xf32>
      %55 = tpu.reciprocal %54 : vector<1x16xf32> -> vector<1x16xf32>
      %c0_37 = arith.constant 0 : index
      %c0_38 = arith.constant 0 : index
      %56 = vector.load %arg11[%c0_37, %c0_38] : memref<1x16xf32, #tpu.memory_space<vmem>>, vector<1x16xf32>
      tpu.vector_store %arg11[%c0_37, %c0_38], %55 {strides = array<i32>} : memref<1x16xf32, #tpu.memory_space<vmem>>, vector<1x16xf32>,
    } else {
    }
    return
  }
  func.func @transform_0(%arg0: i32, %arg1: i32) -> (i32, i32) {
    %c0_i32 = arith.constant 0 : i32
    return %arg0, %arg1 : i32, i32
  }
  func.func @transform_1(%arg0: i32, %arg1: i32) -> (i32, i32) {
    %c0_i32 = arith.constant 0 : i32
    %c0_i32_0 = arith.constant 0 : i32
    %c0_i32_1 = arith.constant 0 : i32
    return %c0_i32, %c0_i32_0 : i32, i32
  }
  func.func @transform_2(%arg0: i32, %arg1: i32) -> (i32, i32) {
    %c0_i32 = arith.constant 0 : i32
    %c0_i32_0 = arith.constant 0 : i32
    %c0_i32_1 = arith.constant 0 : i32
    return %c0_i32, %c0_i32_0 : i32, i32
  }
  func.func @transform_3(%arg0: i32, %arg1: i32) -> (i32, i32) {
    %c0_i32 = arith.constant 0 : i32
    %c0_i32_0 = arith.constant 0 : i32
    %c0_i32_1 = arith.constant 0 : i32
    return %c0_i32, %c0_i32_0 : i32, i32
  }
  func.func @transform_4(%arg0: i32, %arg1: i32) -> (i32, i32) {
    %c0_i32 = arith.constant 0 : i32
    %c0_i32_0 = arith.constant 0 : i32
    %c0_i32_1 = arith.constant 0 : i32
    return %c0_i32, %c0_i32_0 : i32, i32
  }
  func.func @transform_5(%arg0: i32, %arg1: i32) -> (i32, i32) {
    %c0_i32 = arith.constant 0 : i32
    %c0_i32_0 = arith.constant 0 : i32
    %c0_i32_1 = arith.constant 0 : i32
    return %c0_i32, %c0_i32_0 : i32, i32
  }
  func.func @transform_6(%arg0: i32, %arg1: i32) -> (i32, i32) {
    %c0_i32 = arith.constant 0 : i32
    %c0_i32_0 = arith.constant 0 : i32
    %c0_i32_1 = arith.constant 0 : i32
    return %c0_i32, %c0_i32_0 : i32, i32
  }
  func.func @transform_7(%arg0: i32, %arg1: i32) -> (i32, i32) {
    %c0_i32 = arith.constant 0 : i32
    %c0_i32_0 = arith.constant 0 : i32
    %c0_i32_1 = arith.constant 0 : i32
    return %c0_i32, %c0_i32_0 : i32, i32
  }
  func.func @transform_8(%arg0: i32, %arg1: i32) -> (i32, i32) {
    %c0_i32 = arith.constant 0 : i32
    %c0_i32_0 = arith.constant 0 : i32
    %c0_i32_1 = arith.constant 0 : i32
    return %c0_i32, %c0_i32_0 : i32, i32
  }
  func.func @transform_9(%arg0: i32, %arg1: i32) -> (i32, i32) {
    %c0_i32 = arith.constant 0 : i32
    %c0_i32_0 = arith.constant 0 : i32
    return %c0_i32, %arg0 : i32, i32
  }
}

</mosaic_0001>

<bundles_post_ra>
// kernel: discriminator_forward.1
= control target key start
LH: loop header
LB: loop body
LE: loop exit
PB: predicated region body
PF: predicated region fallthrough
CT: control target
= control target key end

     0   :  { %s4944_s0 = inlined_call_operand.vmem [shape: f32[16,256], index: 0, kind: input, shape index: {}]   ;;  %s4945_s1 = inlined_call_operand.hbm [shape: bf16[256,1024], index: 1, kind: input, shape index: {}]   ;;  %s4946_s2 = inlined_call_operand.vmem [shape: f32[1,1024], index: 2, kind: input, shape index: {}]   ;;  %s4947_s3 = inlined_call_operand.hbm [shape: bf16[1024,512], index: 3, kind: input, shape index: {}]   ;;  %s4948_s4 = inlined_call_operand.vmem [shape: f32[1,512], index: 4, kind: input, shape index: {}]   ;;  %s4949_s5 = inlined_call_operand.hbm [shape: bf16[512,256], index: 5, kind: input, shape index: {}]   ;;  %s4950_s6 = inlined_call_operand.vmem [shape: f32[1,256], index: 6, kind: input, shape index: {}]   ;;  %s4951_s7 = inlined_call_operand.vmem [shape: bf16[1,256], index: 7, kind: input, shape index: {}]   ;;  %s4952_s8 = inlined_call_operand.<no memory space> [shape: f32[1,1], index: 8, kind: input, shape index: {}]   ;;  %s4953_s9 = inlined_call_operand.vmem [shape: f32[1,16], index: 9, kind: output, shape index: {}]  }
   0x1   :  { %v14_v0 = vstv %s4952_s8 }
   0x2   :  { %15 = vst [vmem:[#allocation3] sm:$0x1] %v14_v0 }
   0x3   :  { %16 = vsyncpa [#allocation5], 0 }
   0x4   :  { %17 = vsyncpa [#allocation7], 0  ;;  %s4747_s11 = smov [#allocation6]  }
   0x5   :  { %s39_s12 = sshll.u32 %s4747_s11, 4  ;;  %s40_s12 = int_to_ptr.vmem [resolvable:$true] %s39_s12 }
   0x6   :  { %s4691_s13 = scalar_lea.vmem %s40_s12, 32768  ;;  %p4696_p1 = scmp.lt.s32.totalorder %s40_s12, %s40_s12 }
   0x7   :  { %p4692_p0 = scmp.ne.s32.totalorder %s40_s12, %s4691_s13  ;;  %p4697_p2 = scmp.lt.s32.totalorder %s4691_s13, %s4691_s13 }
   0x9   :  { %p4698_p3 = por %p4697_p2, %p4696_p1 }
   0xb   :  { %p4699_p4 = pnand %p4698_p3, %p4692_p0 }
   0xd   :  { %4702 = shalt.err (!%p4699_p4)
}
   0xe   :  { %s4748_s14 = smov 256   ;;  %s4749_s15 = smov 16  }
   0xf   :  { %45 = dma.hbm_to_vmem [thread:$0]  %s4947_s3, 32768, %s40_s12, [#allocation7], %s4748_s14, %s4748_s14, %s4749_s15  }
  0x10   :  { %s4750_s8 = smov [#allocation4]  }
  0x11   :  { %s25_s18 = sshll.u32 %s4750_s8, 4  ;;  %s26_s18 = int_to_ptr.vmem [resolvable:$true] %s25_s18 }
  0x12   :  { %s4711_s19 = scalar_lea.vmem %s26_s18, 16384  ;;  %p4716_p6 = scmp.lt.s32.totalorder %s26_s18, %s26_s18 }
  0x13   :  { %p4712_p5 = scmp.ne.s32.totalorder %s26_s18, %s4711_s19  ;;  %p4717_p7 = scmp.lt.s32.totalorder %s4711_s19, %s4711_s19 }
  0x15   :  { %p4718_p8 = por %p4717_p7, %p4716_p6 }
  0x17   :  { %p4719_p9 = pnand %p4718_p8, %p4712_p5 }
  0x19   :  { %4722 = shalt.err (!%p4719_p9)
}
  0x1a   :  { %s4751_s20 = smov 512   ;;  %s4752_s21 = smov 32  }
  0x1b   :  { %31 = dma.hbm_to_vmem [thread:$0]  %s4945_s1, 16384, %s26_s18, [#allocation5], %s4751_s20, %s4751_s20, %s4752_s21  }
  0x1c   :  { %s4753_s24 = smov [#allocation8]  }
  0x1d   :  { %s53_s25 = sshll.u32 %s4753_s24, 4  ;;  %s54_s25 = int_to_ptr.vmem [resolvable:$true] %s53_s25 }
  0x1e   :  { %s4731_s3 = scalar_lea.vmem %s54_s25, 8192  ;;  %p4736_p11 = scmp.lt.s32.totalorder %s54_s25, %s54_s25 }
  0x1f   :  { %p4732_p10 = scmp.ne.s32.totalorder %s54_s25, %s4731_s3  ;;  %p4737_p12 = scmp.lt.s32.totalorder %s4731_s3, %s4731_s3 }
  0x21   :  { %p4738_p13 = por %p4737_p12, %p4736_p11 }
  0x23   :  { %p4739_p0 = pnand %p4738_p13, %p4732_p10 }
  0x25   :  { %4742 = shalt.err (!%p4739_p0)
}
  0x26   :  { %s4754_s26 = smov 128   ;;  %s4755_s27 = smov 8  }
  0x27   :  { %59 = dma.hbm_to_vmem [thread:$0]  %s4949_s5, 8192, %s54_s25, [#allocation7], %s4754_s26, %s4754_s26, %s4755_s27  }
  0x28   :  { %4743 = dma.done.wait [#allocation5], 16384  }
  0x29   :  { %4744 = vsyncadd [#allocation5], 4294950912 }
  0x2a   :  { %4745 = dma.done.wait [#allocation7], 40960  }
  0x2b   :  { %4746 = vsyncadd [#allocation7], 4294926336  ;;  %v174_v1 = vld [vmem:[#allocation4 + $0x1c0] sm:$0xff]  ;;  %v175_v3 = vld [vmem:[#allocation4 + $0x1c8] sm:$0xff] }
  0x2c   :  { %v178_v2 = vld [vmem:[#allocation4 + $0x1e0] sm:$0xff]  ;;  %v179_v5 = vld [vmem:[#allocation4 + $0x1e8] sm:$0xff]  ;;  %v99_v55 = vld [vmem:[%s4944_s0 + $0x18] sm:$0xff] }
  0x2d   :  { %v3795_v4 = vcombine.high %v174_v1, %v178_v2  ;;  %v3794_v6 = vcombine.low %v174_v1, %v178_v2  ;;  %v166_v7 = vld [vmem:[#allocation4 + $0x180] sm:$0xff]  ;;  %v3797_v9 = vcombine.high %v175_v3, %v179_v5  ;;  %v3796_v10 = vcombine.low %v175_v3, %v179_v5  ;;  %v167_v12 = vld [vmem:[#allocation4 + $0x188] sm:$0xff] }
  0x2e   :  { %v170_v8 = vld [vmem:[#allocation4 + $0x1a0] sm:$0xff]  ;;  %v171_v13 = vld [vmem:[#allocation4 + $0x1a8] sm:$0xff] }
  0x2f   :  { %v3787_v11 = vcombine.high %v166_v7, %v170_v8  ;;  %v158_v14 = vld [vmem:[#allocation4 + $0x140] sm:$0xff]  ;;  %886 = vmatprep.subr.bf16.mxu0 %v3795_v4  ;;  %v3789_v15 = vcombine.high %v167_v12, %v171_v13  ;;  %v159_v17 = vld [vmem:[#allocation4 + $0x148] sm:$0xff]  ;;  %929 = vmatprep.subr.bf16.mxu1 %v3797_v9  ;;  %v3786_v19 = vcombine.low %v166_v7, %v170_v8 }
  0x30   :  { %v162_v16 = vld [vmem:[#allocation4 + $0x160] sm:$0xff]  ;;  %v163_v18 = vld [vmem:[#allocation4 + $0x168] sm:$0xff]  ;;  %887 = vmatpush1.bf16.msra.mxu0 %v3794_v6  ;;  %930 = vmatpush1.bf16.msra.mxu1 %v3796_v10  ;;  %v3788_v20 = vcombine.low %v167_v12, %v171_v13 }
  0x31   :  { %888 = vmatprep.subr.bf16.mxu0 %v3787_v11  ;;  %v3779_v21 = vcombine.high %v158_v14, %v162_v16  ;;  %931 = vmatprep.subr.bf16.mxu1 %v3789_v15  ;;  %v3781_v22 = vcombine.high %v159_v17, %v163_v18  ;;  %v150_v23 = vld [vmem:[#allocation4 + $0x100] sm:$0xff]  ;;  %v151_v25 = vld [vmem:[#allocation4 + $0x108] sm:$0xff]  ;;  %v3778_v27 = vcombine.low %v158_v14, %v162_v16 }
  0x32   :  { %v154_v24 = vld [vmem:[#allocation4 + $0x120] sm:$0xff]  ;;  %v155_v26 = vld [vmem:[#allocation4 + $0x128] sm:$0xff]  ;;  %v3780_v28 = vcombine.low %v159_v17, %v163_v18 }
  0x33   :  { %v3771_v29 = vcombine.high %v150_v23, %v154_v24  ;;  %v3773_v30 = vcombine.high %v151_v25, %v155_v26  ;;  %v142_v31 = vld [vmem:[#allocation4 + $0xc0] sm:$0xff]  ;;  %v143_v33 = vld [vmem:[#allocation4 + $0xc8] sm:$0xff]  ;;  %v3770_v35 = vcombine.low %v150_v23, %v154_v24  ;;  %v3772_v36 = vcombine.low %v151_v25, %v155_v26 }
  0x34   :  { %889 = vmatpush1.bf16.msra.mxu0 %v3786_v19  ;;  %932 = vmatpush1.bf16.msra.mxu1 %v3788_v20  ;;  %v146_v32 = vld [vmem:[#allocation4 + $0xe0] sm:$0xff]  ;;  %v147_v34 = vld [vmem:[#allocation4 + $0xe8] sm:$0xff] }
  0x35   :  { %890 = vmatprep.subr.bf16.mxu0 %v3779_v21  ;;  %933 = vmatprep.subr.bf16.mxu1 %v3781_v22  ;;  %v3763_v37 = vcombine.high %v142_v31, %v146_v32  ;;  %v3765_v38 = vcombine.high %v143_v33, %v147_v34  ;;  %v134_v39 = vld [vmem:[#allocation4 + $0x80] sm:$0xff]  ;;  %v135_v41 = vld [vmem:[#allocation4 + $0x88] sm:$0xff]  ;;  %v3762_v43 = vcombine.low %v142_v31, %v146_v32 }
  0x36   :  { %v138_v40 = vld [vmem:[#allocation4 + $0xa0] sm:$0xff]  ;;  %v139_v42 = vld [vmem:[#allocation4 + $0xa8] sm:$0xff]  ;;  %v3764_v44 = vcombine.low %v143_v33, %v147_v34 }
  0x37   :  { %v3755_v45 = vcombine.high %v134_v39, %v138_v40  ;;  %v3757_v46 = vcombine.high %v135_v41, %v139_v42  ;;  %v126_v47 = vld [vmem:[#allocation4 + $0x40] sm:$0xff]  ;;  %v127_v49 = vld [vmem:[#allocation4 + $0x48] sm:$0xff]  ;;  %v3754_v51 = vcombine.low %v134_v39, %v138_v40  ;;  %v3756_v52 = vcombine.low %v135_v41, %v139_v42 }
  0x38   :  { %891 = vmatpush1.bf16.msra.mxu0 %v3778_v27  ;;  %934 = vmatpush1.bf16.msra.mxu1 %v3780_v28  ;;  %v130_v48 = vld [vmem:[#allocation4 + $0x60] sm:$0xff]  ;;  %v131_v50 = vld [vmem:[#allocation4 + $0x68] sm:$0xff] }
  0x39   :  { %892 = vmatprep.subr.bf16.mxu0 %v3771_v29  ;;  %935 = vmatprep.subr.bf16.mxu1 %v3773_v30  ;;  %v3747_v53 = vcombine.high %v126_v47, %v130_v48  ;;  %v97_v54 = vld [vmem:[%s4944_s0 + $0x8] sm:$0xff]  ;;  %v3749_v56 = vcombine.high %v127_v49, %v131_v50  ;;  %v3746_v62 = vcombine.low %v126_v47, %v130_v48 }
  0x3a   :  { %v118_v57 = vld [vmem:[#allocation4] sm:$0xff]  ;;  %v4826_v59 = vpack.c.bf16 %v99_v55, %v97_v54  ;;  %v119_v60 = vld [vmem:[#allocation4 + $0x8] sm:$0xff]  ;;  %v3748_v63 = vcombine.low %v127_v49, %v131_v50 }
  0x3b   :  { %v122_v58 = vld [vmem:[#allocation4 + $0x20] sm:$0xff]  ;;  %v123_v61 = vld [vmem:[#allocation4 + $0x28] sm:$0xff] }
  0x3c   :  { %893 = vmatpush1.bf16.msra.mxu0 %v3770_v35  ;;  %936 = vmatpush1.bf16.msra.mxu1 %v3772_v36  ;;  %v3739_v0 = vcombine.high %v118_v57, %v122_v58  ;;  %v3741_v1 = vcombine.high %v119_v60, %v123_v61  ;;  %v238_v2 = vld [vmem:[#allocation4 + $0x3c0] sm:$0xff]  ;;  %v239_v4 = vld [vmem:[#allocation4 + $0x3c8] sm:$0xff]  ;;  %v3738_v6 = vcombine.low %v118_v57, %v122_v58 }
  0x3d   :  { %894 = vmatprep.subr.bf16.mxu0 %v3763_v37  ;;  %937 = vmatprep.subr.bf16.mxu1 %v3765_v38  ;;  %v242_v3 = vld [vmem:[#allocation4 + $0x3e0] sm:$0xff]  ;;  %v243_v5 = vld [vmem:[#allocation4 + $0x3e8] sm:$0xff]  ;;  %v3740_v7 = vcombine.low %v119_v60, %v123_v61 }
  0x3e   :  { %918 = vmatprep.mubr.bf16.mxu0 %v4826_v59  ;;  %961 = vmatprep.mubr.bf16.mxu1 %v4826_v59  ;;  %v3859_v8 = vcombine.high %v238_v2, %v242_v3  ;;  %v3861_v9 = vcombine.high %v239_v4, %v243_v5  ;;  %v230_v10 = vld [vmem:[#allocation4 + $0x380] sm:$0xff]  ;;  %v231_v12 = vld [vmem:[#allocation4 + $0x388] sm:$0xff]  ;;  %v3858_v14 = vcombine.low %v238_v2, %v242_v3 }
  0x3f   :  { %v234_v11 = vld [vmem:[#allocation4 + $0x3a0] sm:$0xff]  ;;  %v235_v13 = vld [vmem:[#allocation4 + $0x3a8] sm:$0xff]  ;;  %v3860_v15 = vcombine.low %v239_v4, %v243_v5  ;;  %v176_v4 = vld [vmem:[#allocation4 + $0x1d0] sm:$0xff] }
  0x40   :  { %895 = vmatpush1.bf16.msra.mxu0 %v3762_v43  ;;  %938 = vmatpush1.bf16.msra.mxu1 %v3764_v44  ;;  %v3851_v16 = vcombine.high %v230_v10, %v234_v11  ;;  %v3853_v17 = vcombine.high %v231_v12, %v235_v13  ;;  %v222_v18 = vld [vmem:[#allocation4 + $0x340] sm:$0xff]  ;;  %v223_v20 = vld [vmem:[#allocation4 + $0x348] sm:$0xff]  ;;  %v3850_v22 = vcombine.low %v230_v10, %v234_v11  ;;  %v180_v5 = vld [vmem:[#allocation4 + $0x1f0] sm:$0xff] }
  0x41   :  { %896 = vmatprep.subr.bf16.mxu0 %v3755_v45  ;;  %939 = vmatprep.subr.bf16.mxu1 %v3757_v46  ;;  %v226_v19 = vld [vmem:[#allocation4 + $0x360] sm:$0xff]  ;;  %v227_v21 = vld [vmem:[#allocation4 + $0x368] sm:$0xff]  ;;  %v3852_v23 = vcombine.low %v231_v12, %v235_v13  ;;  %v3799_v11 = vcombine.high %v176_v4, %v180_v5  ;;  %v168_v13 = vld [vmem:[#allocation4 + $0x190] sm:$0xff] }
  0x42   :  { %v3843_v24 = vcombine.high %v222_v18, %v226_v19  ;;  %v3845_v25 = vcombine.high %v223_v20, %v227_v21  ;;  %v214_v26 = vld [vmem:[#allocation4 + $0x300] sm:$0xff]  ;;  %v215_v28 = vld [vmem:[#allocation4 + $0x308] sm:$0xff]  ;;  %v3842_v30 = vcombine.low %v222_v18, %v226_v19  ;;  %v3844_v31 = vcombine.low %v223_v20, %v227_v21 }
  0x43   :  { %v218_v27 = vld [vmem:[#allocation4 + $0x320] sm:$0xff]  ;;  %v219_v29 = vld [vmem:[#allocation4 + $0x328] sm:$0xff]  ;;  %v3798_v18 = vcombine.low %v176_v4, %v180_v5  ;;  %v244_v4 = vld [vmem:[#allocation4 + $0x3f0] sm:$0xff] }
  0x44   :  { %897 = vmatpush1.bf16.msra.mxu0 %v3754_v51  ;;  %940 = vmatpush1.bf16.msra.mxu1 %v3756_v52  ;;  %v3835_v32 = vcombine.high %v214_v26, %v218_v27  ;;  %v3837_v33 = vcombine.high %v215_v28, %v219_v29  ;;  %v206_v34 = vld [vmem:[#allocation4 + $0x2c0] sm:$0xff]  ;;  %v207_v36 = vld [vmem:[#allocation4 + $0x2c8] sm:$0xff]  ;;  %v3834_v38 = vcombine.low %v214_v26, %v218_v27 }
  0x45   :  { %898 = vmatprep.subr.bf16.mxu0 %v3747_v53  ;;  %941 = vmatprep.subr.bf16.mxu1 %v3749_v56  ;;  %v210_v35 = vld [vmem:[#allocation4 + $0x2e0] sm:$0xff]  ;;  %v211_v37 = vld [vmem:[#allocation4 + $0x2e8] sm:$0xff]  ;;  %v3836_v39 = vcombine.low %v215_v28, %v219_v29 }
  0x46   :  { %v3827_v40 = vcombine.high %v206_v34, %v210_v35  ;;  %v3829_v41 = vcombine.high %v207_v36, %v211_v37  ;;  %v198_v42 = vld [vmem:[#allocation4 + $0x280] sm:$0xff]  ;;  %v199_v44 = vld [vmem:[#allocation4 + $0x288] sm:$0xff]  ;;  %v3826_v46 = vcombine.low %v206_v34, %v210_v35  ;;  %v3828_v47 = vcombine.low %v207_v36, %v211_v37 }
  0x47   :  { %v202_v43 = vld [vmem:[#allocation4 + $0x2a0] sm:$0xff]  ;;  %v203_v45 = vld [vmem:[#allocation4 + $0x2a8] sm:$0xff] }
  0x48   :  { %899 = vmatpush1.bf16.msra.mxu0 %v3746_v62  ;;  %942 = vmatpush1.bf16.msra.mxu1 %v3748_v63  ;;  %v3819_v48 = vcombine.high %v198_v42, %v202_v43  ;;  %v3821_v49 = vcombine.high %v199_v44, %v203_v45  ;;  %v190_v50 = vld [vmem:[#allocation4 + $0x240] sm:$0xff]  ;;  %v191_v52 = vld [vmem:[#allocation4 + $0x248] sm:$0xff]  ;;  %v3818_v54 = vcombine.low %v198_v42, %v202_v43  ;;  %v136_v43 = vld [vmem:[#allocation4 + $0x90] sm:$0xff] }
  0x49   :  { %900 = vmatprep.subr.bf16.mxu0 %v3739_v0  ;;  %943 = vmatprep.subr.bf16.mxu1 %v3741_v1  ;;  %v194_v51 = vld [vmem:[#allocation4 + $0x260] sm:$0xff]  ;;  %v195_v53 = vld [vmem:[#allocation4 + $0x268] sm:$0xff]  ;;  %v3820_v55 = vcombine.low %v199_v44, %v203_v45 }
  0x4a   :  { %v3811_v56 = vcombine.high %v190_v50, %v194_v51  ;;  %v3813_v57 = vcombine.high %v191_v52, %v195_v53  ;;  %v182_v58 = vld [vmem:[#allocation4 + $0x200] sm:$0xff]  ;;  %v183_v61 = vld [vmem:[#allocation4 + $0x208] sm:$0xff]  ;;  %v3810_v63 = vcombine.low %v190_v50, %v194_v51  ;;  %v3812_v0 = vcombine.low %v191_v52, %v195_v53  ;;  %v128_v50 = vld [vmem:[#allocation4 + $0x50] sm:$0xff] }
  0x4b   :  { %v186_v60 = vld [vmem:[#allocation4 + $0x220] sm:$0xff]  ;;  %v187_v62 = vld [vmem:[#allocation4 + $0x228] sm:$0xff]  ;;  %v132_v51 = vld [vmem:[#allocation4 + $0x70] sm:$0xff] }
  0x4c   :  { %901 = vmatpush1.bf16.msra.mxu0 %v3738_v6  ;;  %944 = vmatpush1.bf16.msra.mxu1 %v3740_v7  ;;  %v3803_v1 = vcombine.high %v182_v58, %v186_v60  ;;  %v3805_v2 = vcombine.high %v183_v61, %v187_v62  ;;  %v96_v3 = vld [vmem:[%s4944_s0] sm:$0xff]  ;;  %v3804_v10 = vcombine.low %v183_v61, %v187_v62 }
  0x4d   :  { %902 = vmatprep.subr.bf16.mxu0 %v3859_v8  ;;  %945 = vmatprep.subr.bf16.mxu1 %v3861_v9  ;;  %v177_v6 = vld [vmem:[#allocation4 + $0x1d8] sm:$0xff]  ;;  %v3802_v8 = vcombine.low %v182_v58, %v186_v60  ;;  %v98_v9 = vld [vmem:[%s4944_s0 + $0x10] sm:$0xff]  ;;  %v3751_v62 = vcombine.high %v128_v50, %v132_v51 }
  0x4e   :  { %v181_v7 = vld [vmem:[#allocation4 + $0x1f8] sm:$0xff]  ;;  %v120_v58 = vld [vmem:[#allocation4 + $0x10] sm:$0xff] }
  0x4f   :  { %v3801_v12 = vcombine.high %v177_v6, %v181_v7  ;;  %v3800_v19 = vcombine.low %v177_v6, %v181_v7  ;;  %v124_v60 = vld [vmem:[#allocation4 + $0x30] sm:$0xff]  ;;  %v241_v7 = vld [vmem:[#allocation4 + $0x3d8] sm:$0xff] }
  0x50   :  { %903 = vmatpush2.bf16.msra.mxu0 %v3858_v14  ;;  %946 = vmatpush2.bf16.msra.mxu1 %v3860_v15  ;;  %v172_v14 = vld [vmem:[#allocation4 + $0x1b0] sm:$0xff]  ;;  %v4836_v15 = vpack.c.bf16 %v98_v9, %v96_v3  ;;  %v3743_v6 = vcombine.high %v120_v58, %v124_v60 }
  0x51   :  { %904 = vmatprep.subr.bf16.mxu0 %v3851_v16  ;;  %947 = vmatprep.subr.bf16.mxu1 %v3853_v17  ;;  %v169_v16 = vld [vmem:[#allocation4 + $0x198] sm:$0xff]  ;;  %v3791_v20 = vcombine.high %v168_v13, %v172_v14  ;;  %v3790_v26 = vcombine.low %v168_v13, %v172_v14  ;;  %v240_v3 = vld [vmem:[#allocation4 + $0x3d0] sm:$0xff] }
  0x52   :  { %v173_v17 = vld [vmem:[#allocation4 + $0x1b8] sm:$0xff]  ;;  %v3863_v14 = vcombine.high %v240_v3, %v244_v4 }
  0x53   :  { %v3793_v21 = vcombine.high %v169_v16, %v173_v17  ;;  %v3792_v27 = vcombine.low %v169_v16, %v173_v17  ;;  %v233_v16 = vld [vmem:[#allocation4 + $0x398] sm:$0xff] }
  0x54   :  { %905 = vmatpush2.bf16.msra.mxu0 %v3850_v22  ;;  %948 = vmatpush2.bf16.msra.mxu1 %v3852_v23  ;;  %v160_v22 = vld [vmem:[#allocation4 + $0x150] sm:$0xff]  ;;  %v237_v17 = vld [vmem:[#allocation4 + $0x3b8] sm:$0xff] }
  0x55   :  { %906 = vmatprep.subr.bf16.mxu0 %v3843_v24  ;;  %949 = vmatprep.subr.bf16.mxu1 %v3845_v25  ;;  %v164_v23 = vld [vmem:[#allocation4 + $0x170] sm:$0xff]  ;;  %v161_v24 = vld [vmem:[#allocation4 + $0x158] sm:$0xff] }
  0x56   :  { %v165_v25 = vld [vmem:[#allocation4 + $0x178] sm:$0xff]  ;;  %v3783_v28 = vcombine.high %v160_v22, %v164_v23  ;;  %v3782_v34 = vcombine.low %v160_v22, %v164_v23 }
  0x57   :  { %v3785_v29 = vcombine.high %v161_v24, %v165_v25  ;;  %v3784_v35 = vcombine.low %v161_v24, %v165_v25  ;;  %v225_v24 = vld [vmem:[#allocation4 + $0x358] sm:$0xff] }
  0x58   :  { %907 = vmatpush2.bf16.msra.mxu0 %v3842_v30  ;;  %950 = vmatpush2.bf16.msra.mxu1 %v3844_v31  ;;  %v152_v30 = vld [vmem:[#allocation4 + $0x110] sm:$0xff]  ;;  %v229_v25 = vld [vmem:[#allocation4 + $0x378] sm:$0xff] }
  0x59   :  { %908 = vmatprep.subr.bf16.mxu0 %v3835_v32  ;;  %951 = vmatprep.subr.bf16.mxu1 %v3837_v33  ;;  %v156_v31 = vld [vmem:[#allocation4 + $0x130] sm:$0xff]  ;;  %v153_v32 = vld [vmem:[#allocation4 + $0x118] sm:$0xff] }
  0x5a   :  { %v157_v33 = vld [vmem:[#allocation4 + $0x138] sm:$0xff]  ;;  %v3775_v36 = vcombine.high %v152_v30, %v156_v31  ;;  %v3774_v42 = vcombine.low %v152_v30, %v156_v31  ;;  %v3856_v30 = vcombine.low %v233_v16, %v237_v17 }
  0x5b   :  { %v3777_v37 = vcombine.high %v153_v32, %v157_v33  ;;  %v3776_v44 = vcombine.low %v153_v32, %v157_v33  ;;  %v217_v32 = vld [vmem:[#allocation4 + $0x318] sm:$0xff] }
  0x5c   :  { %909 = vmatpush2.bf16.msra.mxu0 %v3834_v38  ;;  %952 = vmatpush2.bf16.msra.mxu1 %v3836_v39  ;;  %v144_v38 = vld [vmem:[#allocation4 + $0xd0] sm:$0xff]  ;;  %v221_v33 = vld [vmem:[#allocation4 + $0x338] sm:$0xff] }
  0x5d   :  { %910 = vmatprep.subr.bf16.mxu0 %v3827_v40  ;;  %953 = vmatprep.subr.bf16.mxu1 %v3829_v41  ;;  %v148_v39 = vld [vmem:[#allocation4 + $0xf0] sm:$0xff]  ;;  %v145_v40 = vld [vmem:[#allocation4 + $0xd8] sm:$0xff] }
  0x5e   :  { %v149_v41 = vld [vmem:[#allocation4 + $0xf8] sm:$0xff]  ;;  %v3767_v45 = vcombine.high %v144_v38, %v148_v39 }
  0x5f   :  { %v3768_v52 = vcombine.low %v145_v40, %v149_v41 }
  0x60   :  { %911 = vmatpush2.bf16.msra.mxu0 %v3826_v46  ;;  %954 = vmatpush2.bf16.msra.mxu1 %v3828_v47  ;;  %v3769_v46 = vcombine.high %v145_v40, %v149_v41  ;;  %v137_v47 = vld [vmem:[#allocation4 + $0x98] sm:$0xff] }
  0x61   :  { %912 = vmatprep.subr.bf16.mxu0 %v3819_v48  ;;  %955 = vmatprep.subr.bf16.mxu1 %v3821_v49  ;;  %v141_v48 = vld [vmem:[#allocation4 + $0xb8] sm:$0xff]  ;;  %v3766_v49 = vcombine.low %v144_v38, %v148_v39  ;;  %v3848_v38 = vcombine.low %v225_v24, %v229_v25 }
  0x62   :  { %v3760_v61 = vcombine.low %v137_v47, %v141_v48  ;;  %v209_v40 = vld [vmem:[#allocation4 + $0x2d8] sm:$0xff] }
  0x63   :  { %v213_v41 = vld [vmem:[#allocation4 + $0x2f8] sm:$0xff] }
  0x64   :  { %913 = vmatpush2.bf16.msra.mxu0 %v3818_v54  ;;  %956 = vmatpush2.bf16.msra.mxu1 %v3820_v55  ;;  %v129_v54 = vld [vmem:[#allocation4 + $0x58] sm:$0xff] }
  0x65   :  { %914 = vmatprep.subr.bf16.mxu0 %v3811_v56  ;;  %957 = vmatprep.subr.bf16.mxu1 %v3813_v57  ;;  %v133_v55 = vld [vmem:[#allocation4 + $0x78] sm:$0xff]  ;;  %v3761_v56 = vcombine.high %v137_v47, %v141_v48 }
  0x66   :  { %v3752_v5 = vcombine.low %v129_v54, %v133_v55  ;;  %v201_v47 = vld [vmem:[#allocation4 + $0x298] sm:$0xff] }
  0x67   :  { %v205_v48 = vld [vmem:[#allocation4 + $0x2b8] sm:$0xff] }
  0x68   :  { %915 = vmatpush2.bf16.msra.mxu0 %v3810_v63  ;;  %958 = vmatpush2.bf16.msra.mxu1 %v3812_v0  ;;  %v121_v63 = vld [vmem:[#allocation4 + $0x18] sm:$0xff] }
  0x69   :  { %916 = vmatprep.subr.bf16.mxu0 %v3803_v1  ;;  %959 = vmatprep.subr.bf16.mxu1 %v3805_v2  ;;  %v125_v0 = vld [vmem:[#allocation4 + $0x38] sm:$0xff]  ;;  %v3753_v1 = vcombine.high %v129_v54, %v133_v55  ;;  %v3750_v2 = vcombine.low %v128_v50, %v132_v51  ;;  %v192_v51 = vld [vmem:[#allocation4 + $0x250] sm:$0xff] }
  0x6a   :  { %v3745_v9 = vcombine.high %v121_v63, %v125_v0  ;;  %v3744_v13 = vcombine.low %v121_v63, %v125_v0  ;;  %v193_v55 = vld [vmem:[#allocation4 + $0x258] sm:$0xff] }
  0x6b   :  { %v185_v0 = vld [vmem:[#allocation4 + $0x218] sm:$0xff] }
  0x6c   :  { %917 = vmatpush2.bf16.msra.mxu0 %v3802_v8  ;;  %960 = vmatpush2.bf16.msra.mxu1 %v3804_v10  ;;  %v245_v8 = vld [vmem:[#allocation4 + $0x3f8] sm:$0xff]  ;;  %v3742_v10 = vcombine.low %v120_v58, %v124_v60  ;;  %v184_v60 = vld [vmem:[#allocation4 + $0x210] sm:$0xff] }
  0x6d   :  { %972 = vmatprep.subr.bf16.mxu0 %v3799_v11  ;;  %1015 = vmatprep.subr.bf16.mxu1 %v3801_v12  ;;  %v232_v11 = vld [vmem:[#allocation4 + $0x390] sm:$0xff]  ;;  %v3864_v22 = vcombine.low %v241_v7, %v245_v8 }
  0x6e   :  { %v236_v12 = vld [vmem:[#allocation4 + $0x3b0] sm:$0xff] }
  0x6f   :  { %919 = vmatmul.mubr.bf16.vlgmr.msra.gmra.mxu0 %v4836_v15  ;;  %962 = vmatmul.mubr.bf16.vlgmr.msra.gmra.mxu1 %v4836_v15  ;;  %v3855_v23 = vcombine.high %v232_v11, %v236_v12 }
  0x70   :  { %973 = vmatpush1.bf16.msra.mxu0 %v3798_v18  ;;  %1016 = vmatpush1.bf16.msra.mxu1 %v3800_v19  ;;  %v3865_v18 = vcombine.high %v241_v7, %v245_v8  ;;  %v3862_v19 = vcombine.low %v240_v3, %v244_v4  ;;  %v4201_v7 = vld [vmem:[#allocation6 + $0xe4] ss:$16 sps:$4 sm:$0xff]  }
  0x71   :  { %974 = vmatprep.subr.bf16.mxu0 %v3791_v20  ;;  %1017 = vmatprep.subr.bf16.mxu1 %v3793_v21  ;;  %v224_v20 = vld [vmem:[#allocation4 + $0x350] sm:$0xff] }
  0x72   :  { %1004 = vmatprep.mubr.bf16.mxu0 %v4826_v59  ;;  %1047 = vmatprep.mubr.bf16.mxu1 %v4826_v59  ;;  %v140_v59 = vld [vmem:[#allocation4 + $0xb0] sm:$0xff] }
  0x73   :  { %v3759_v53 = vcombine.high %v136_v43, %v140_v59  ;;  %v3758_v57 = vcombine.low %v136_v43, %v140_v59  ;;  %v228_v21 = vld [vmem:[#allocation4 + $0x370] sm:$0xff]  ;;  %v3840_v59 = vcombine.low %v217_v32, %v221_v33 }
  0x74   :  { %975 = vmatpush1.bf16.msra.mxu0 %v3790_v26  ;;  %1018 = vmatpush1.bf16.msra.mxu1 %v3792_v27  ;;  %v3857_v26 = vcombine.high %v233_v16, %v237_v17  ;;  %v3854_v27 = vcombine.low %v232_v11, %v236_v12  ;;  %v3847_v31 = vcombine.high %v224_v20, %v228_v21  ;;  %v4199_v11 = vld [vmem:[#allocation6 + $0xe0] ss:$16 sps:$4 sm:$0xff]  }
  0x75   :  { %976 = vmatprep.subr.bf16.mxu0 %v3783_v28  ;;  %1019 = vmatprep.subr.bf16.mxu1 %v3785_v29  ;;  %v216_v28 = vld [vmem:[#allocation4 + $0x310] sm:$0xff] }
  0x76   :  { %v220_v29 = vld [vmem:[#allocation4 + $0x330] sm:$0xff] }
  0x77   :  { %v3839_v39 = vcombine.high %v216_v28, %v220_v29  ;;  %v3838_v43 = vcombine.low %v216_v28, %v220_v29  ;;  %v4202_v12 = vld [vmem:[#allocation6 + $0x2e0] ss:$16 sps:$4 sm:$0xff]   ;;  %v4231_v29 = vld [vmem:[#allocation6 + $0x44] ss:$16 sps:$4 sm:$0xff]  }
  0x78   :  { %977 = vmatpush1.bf16.msra.mxu0 %v3782_v34  ;;  %1020 = vmatpush1.bf16.msra.mxu1 %v3784_v35  ;;  %v3849_v34 = vcombine.high %v225_v24, %v229_v25  ;;  %v3846_v35 = vcombine.low %v224_v20, %v228_v21  ;;  %v4205_v16 = vld [vmem:[#allocation6 + $0xc0] ss:$16 sps:$4 sm:$0xff]  }
  0x79   :  { %978 = vmatprep.subr.bf16.mxu0 %v3775_v36  ;;  %1021 = vmatprep.subr.bf16.mxu1 %v3777_v37  ;;  %v208_v36 = vld [vmem:[#allocation4 + $0x2d0] sm:$0xff] }
  0x7a   :  { %v212_v37 = vld [vmem:[#allocation4 + $0x2f0] sm:$0xff] }
  0x7b   :  { %v3830_v50 = vcombine.low %v208_v36, %v212_v37  ;;  %v4208_v17 = vld [vmem:[#allocation6 + $0x2c0] ss:$16 sps:$4 sm:$0xff]  }
  0x7c   :  { %979 = vmatpush1.bf16.msra.mxu0 %v3774_v42  ;;  %1022 = vmatpush1.bf16.msra.mxu1 %v3776_v44  ;;  %v3841_v42 = vcombine.high %v217_v32, %v221_v33  ;;  %v200_v44 = vld [vmem:[#allocation4 + $0x290] sm:$0xff] }
  0x7d   :  { %980 = vmatprep.subr.bf16.mxu0 %v3767_v45  ;;  %1023 = vmatprep.subr.bf16.mxu1 %v3769_v46  ;;  %v204_v45 = vld [vmem:[#allocation4 + $0x2b0] sm:$0xff]  ;;  %v3831_v46 = vcombine.high %v208_v36, %v212_v37 }
  0x7e   :  { %v3823_v54 = vcombine.high %v200_v44, %v204_v45  ;;  %v3822_v58 = vcombine.low %v200_v44, %v204_v45  ;;  %v4211_v20 = vld [vmem:[#allocation6 + $0xa0] ss:$16 sps:$4 sm:$0xff]   ;;  %v4237_v33 = vld [vmem:[#allocation6 + $0x24] ss:$16 sps:$4 sm:$0xff]  }
  0x7f   :  { %v4214_v21 = vld [vmem:[#allocation6 + $0x2a0] ss:$16 sps:$4 sm:$0xff]   ;;  %v4243_v37 = vld [vmem:[#allocation6 + $0x4] ss:$16 sps:$4 sm:$0xff]  }
  0x80   :  { %981 = vmatpush1.bf16.msra.mxu0 %v3766_v49  ;;  %1024 = vmatpush1.bf16.msra.mxu1 %v3768_v52  ;;  %v3833_v49 = vcombine.high %v209_v40, %v213_v41  ;;  %v196_v52 = vld [vmem:[#allocation4 + $0x270] sm:$0xff] }
  0x81   :  { %982 = vmatprep.subr.bf16.mxu0 %v3759_v53  ;;  %1025 = vmatprep.subr.bf16.mxu1 %v3761_v56  ;;  %v3832_v53 = vcombine.low %v209_v40, %v213_v41  ;;  %v197_v56 = vld [vmem:[#allocation4 + $0x278] sm:$0xff]  ;;  %v3815_v63 = vcombine.high %v192_v51, %v196_v52  ;;  %v3814_v3 = vcombine.low %v192_v51, %v196_v52  ;;  %v4217_v24 = vld [vmem:[#allocation6 + $0x80] ss:$16 sps:$4 sm:$0xff]   ;;  %v4249_v41 = vld [vmem:[#allocation6 + $0x1e4] ss:$16 sps:$4 sm:$0xff]  }
  0x82   :  { %v3816_v4 = vcombine.low %v193_v55, %v197_v56  ;;  %v4220_v25 = vld [vmem:[#allocation6 + $0x280] ss:$16 sps:$4 sm:$0xff]   ;;  %v4255_v45 = vld [vmem:[#allocation6 + $0x1c4] ss:$16 sps:$4 sm:$0xff]  }
  0x83   :  { %v4226_v28 = vld [vmem:[#allocation6 + $0x260] ss:$16 sps:$4 sm:$0xff]   ;;  %v4267_v52 = vld [vmem:[#allocation6 + $0x184] ss:$16 sps:$4 sm:$0xff]  }
  0x84   :  { %983 = vmatpush1.bf16.msra.mxu0 %v3758_v57  ;;  %1026 = vmatpush1.bf16.msra.mxu1 %v3760_v61  ;;  %v3825_v57 = vcombine.high %v201_v47, %v205_v48  ;;  %v188_v61 = vld [vmem:[#allocation4 + $0x230] sm:$0xff] }
  0x85   :  { %984 = vmatprep.subr.bf16.mxu0 %v3751_v62  ;;  %1027 = vmatprep.subr.bf16.mxu1 %v3753_v1  ;;  %v3824_v62 = vcombine.low %v201_v47, %v205_v48  ;;  %v189_v1 = vld [vmem:[#allocation4 + $0x238] sm:$0xff]  ;;  %v3806_v8 = vcombine.low %v184_v60, %v188_v61  ;;  %v4232_v32 = vld [vmem:[#allocation6 + $0x240] ss:$16 sps:$4 sm:$0xff]   ;;  %v4261_v48 = vld [vmem:[#allocation6 + $0x1a4] ss:$16 sps:$4 sm:$0xff]  }
  0x86   :  { %v4238_v36 = vld [vmem:[#allocation6 + $0x220] ss:$16 sps:$4 sm:$0xff]  }
  0x87   :  { %v4244_v40 = vld [vmem:[#allocation6 + $0x200] ss:$16 sps:$4 sm:$0xff]  }
  0x88   :  { %985 = vmatpush1.bf16.msra.mxu0 %v3750_v2  ;;  %1028 = vmatpush1.bf16.msra.mxu1 %v3752_v5  ;;  %v3817_v2 = vcombine.high %v193_v55, %v197_v56  ;;  %v3807_v5 = vcombine.high %v184_v60, %v188_v61  ;;  %v4250_v44 = vld [vmem:[#allocation6 + $0x3e0] ss:$16 sps:$4 sm:$0xff]   ;;  %v4273_v56 = vld [vmem:[#allocation6 + $0x164] ss:$16 sps:$4 sm:$0xff]  }
  0x89   :  { %986 = vmatprep.subr.bf16.mxu0 %v3743_v6  ;;  %1029 = vmatprep.subr.bf16.mxu1 %v3745_v9  ;;  %v3809_v6 = vcombine.high %v185_v0, %v189_v1  ;;  %v4204_v9 = vld [vmem:[#allocation6 + $0x2e4] ss:$16 sps:$4 sm:$0xff]   ;;  %v4256_v47 = vld [vmem:[#allocation6 + $0x3c0] ss:$16 sps:$4 sm:$0xff]  }
  0x8a   :  { %v4262_v51 = vld [vmem:[#allocation6 + $0x3a0] ss:$16 sps:$4 sm:$0xff]   ;;  %v4279_v61 = vld [vmem:[#allocation6 + $0x144] ss:$16 sps:$4 sm:$0xff]  }
  0x8b   :  { %v4268_v55 = vld [vmem:[#allocation6 + $0x380] ss:$16 sps:$4 sm:$0xff]  }
  0x8c   :  { %987 = vmatpush1.bf16.msra.mxu0 %v3742_v10  ;;  %1030 = vmatpush1.bf16.msra.mxu1 %v3744_v13  ;;  %v3808_v10 = vcombine.low %v185_v0, %v189_v1  ;;  %v4207_v13 = vld [vmem:[#allocation6 + $0xc4] ss:$16 sps:$4 sm:$0xff]   ;;  %v4274_v60 = vld [vmem:[#allocation6 + $0x360] ss:$16 sps:$4 sm:$0xff]  }
  0x8d   :  { %988 = vmatprep.subr.bf16.mxu0 %v3863_v14  ;;  %1031 = vmatprep.subr.bf16.mxu1 %v3865_v18  ;;  %v4210_v14 = vld [vmem:[#allocation6 + $0x2c4] ss:$16 sps:$4 sm:$0xff]   ;;  %v4280_v0 = vld [vmem:[#allocation6 + $0x340] ss:$16 sps:$4 sm:$0xff]  }
  0x8e   :  { %v4213_v18 = vld [vmem:[#allocation6 + $0xa4] ss:$16 sps:$4 sm:$0xff]  }
  0x8f   :  { %v4285_v1 = vld [vmem:[#allocation6 + $0x124] ss:$16 sps:$4 sm:$0xff]  }
  0x90   :  { %989 = vmatpush2.bf16.msra.mxu0 %v3862_v19  ;;  %1032 = vmatpush2.bf16.msra.mxu1 %v3864_v22  ;;  %v4216_v19 = vld [vmem:[#allocation6 + $0x2a4] ss:$16 sps:$4 sm:$0xff]  }
  0x91   :  { %990 = vmatprep.subr.bf16.mxu0 %v3855_v23  ;;  %1033 = vmatprep.subr.bf16.mxu1 %v3857_v26  ;;  %v4219_v22 = vld [vmem:[#allocation6 + $0x84] ss:$16 sps:$4 sm:$0xff]  }
  0x92   :  { %v4222_v23 = vld [vmem:[#allocation6 + $0x284] ss:$16 sps:$4 sm:$0xff]  }
  0x93   :  { %v4228_v26 = vld [vmem:[#allocation6 + $0x264] ss:$16 sps:$4 sm:$0xff]  }
  0x94   :  { %991 = vmatpush2.bf16.msra.mxu0 %v3854_v27  ;;  %1034 = vmatpush2.bf16.msra.mxu1 %v3856_v30  ;;  %v4223_v27 = vld [vmem:[#allocation6 + $0x60] ss:$16 sps:$4 sm:$0xff]   ;;  %v4234_v30 = vld [vmem:[#allocation6 + $0x244] ss:$16 sps:$4 sm:$0xff]  }
  0x95   :  { %992 = vmatprep.subr.bf16.mxu0 %v3847_v31  ;;  %1035 = vmatprep.subr.bf16.mxu1 %v3849_v34  ;;  %v4229_v31 = vld [vmem:[#allocation6 + $0x40] ss:$16 sps:$4 sm:$0xff]   ;;  %v4240_v34 = vld [vmem:[#allocation6 + $0x224] ss:$16 sps:$4 sm:$0xff]  }
  0x98   :  { %993 = vmatpush2.bf16.msra.mxu0 %v3846_v35  ;;  %1036 = vmatpush2.bf16.msra.mxu1 %v3848_v38  ;;  %v4235_v35 = vld [vmem:[#allocation6 + $0x20] ss:$16 sps:$4 sm:$0xff]   ;;  %v4246_v38 = vld [vmem:[#allocation6 + $0x204] ss:$16 sps:$4 sm:$0xff]  }
  0x99   :  { %994 = vmatprep.subr.bf16.mxu0 %v3839_v39  ;;  %1037 = vmatprep.subr.bf16.mxu1 %v3841_v42  ;;  %v4241_v39 = vld [vmem:[#allocation6] ss:$16 sps:$4 sm:$0xff]   ;;  %v4252_v42 = vld [vmem:[#allocation6 + $0x3e4] ss:$16 sps:$4 sm:$0xff]  }
  0x9c   :  { %995 = vmatpush2.bf16.msra.mxu0 %v3838_v43  ;;  %1038 = vmatpush2.bf16.msra.mxu1 %v3840_v59  ;;  %v4247_v43 = vld [vmem:[#allocation6 + $0x1e0] ss:$16 sps:$4 sm:$0xff]   ;;  %v4258_v59 = vld [vmem:[#allocation6 + $0x3c4] ss:$16 sps:$4 sm:$0xff]  }
  0x9d   :  { %996 = vmatprep.subr.bf16.mxu0 %v3831_v46  ;;  %1039 = vmatprep.subr.bf16.mxu1 %v3833_v49  ;;  %v4253_v46 = vld [vmem:[#allocation6 + $0x1c0] ss:$16 sps:$4 sm:$0xff]   ;;  %v4264_v49 = vld [vmem:[#allocation6 + $0x3a4] ss:$16 sps:$4 sm:$0xff]  }
  0xa0   :  { %997 = vmatpush2.bf16.msra.mxu0 %v3830_v50  ;;  %1040 = vmatpush2.bf16.msra.mxu1 %v3832_v53  ;;  %v4259_v50 = vld [vmem:[#allocation6 + $0x1a0] ss:$16 sps:$4 sm:$0xff]   ;;  %v4270_v53 = vld [vmem:[#allocation6 + $0x384] ss:$16 sps:$4 sm:$0xff]  }
  0xa1   :  { %998 = vmatprep.subr.bf16.mxu0 %v3823_v54  ;;  %1041 = vmatprep.subr.bf16.mxu1 %v3825_v57  ;;  %v4265_v54 = vld [vmem:[#allocation6 + $0x180] ss:$16 sps:$4 sm:$0xff]   ;;  %v4276_v57 = vld [vmem:[#allocation6 + $0x364] ss:$16 sps:$4 sm:$0xff]  }
  0xa4   :  { %999 = vmatpush2.bf16.msra.mxu0 %v3822_v58  ;;  %1042 = vmatpush2.bf16.msra.mxu1 %v3824_v62  ;;  %v4271_v58 = vld [vmem:[#allocation6 + $0x160] ss:$16 sps:$4 sm:$0xff]   ;;  %v4282_v62 = vld [vmem:[#allocation6 + $0x344] ss:$16 sps:$4 sm:$0xff]  }
  0xa5   :  { %1000 = vmatprep.subr.bf16.mxu0 %v3815_v63  ;;  %1043 = vmatprep.subr.bf16.mxu1 %v3817_v2  ;;  %v4277_v63 = vld [vmem:[#allocation6 + $0x140] ss:$16 sps:$4 sm:$0xff]   ;;  %v4288_v2 = vld [vmem:[#allocation6 + $0x324] ss:$16 sps:$4 sm:$0xff]  }
  0xa8   :  { %1001 = vmatpush2.bf16.msra.mxu0 %v3814_v3  ;;  %1044 = vmatpush2.bf16.msra.mxu1 %v3816_v4  ;;  %v4283_v3 = vld [vmem:[#allocation6 + $0x120] ss:$16 sps:$4 sm:$0xff]  }
  0xa9   :  { %1002 = vmatprep.subr.bf16.mxu0 %v3807_v5  ;;  %1045 = vmatprep.subr.bf16.mxu1 %v3809_v6  ;;  %v4286_v4 = vld [vmem:[#allocation6 + $0x320] ss:$16 sps:$4 sm:$0xff]   ;;  %v4291_v5 = vld [vmem:[#allocation6 + $0x104] ss:$16 sps:$4 sm:$0xff]  }
  0xaa   :  { %v4294_v6 = vld [vmem:[#allocation6 + $0x304] ss:$16 sps:$4 sm:$0xff]  }
  0xac   :  { %1003 = vmatpush2.bf16.msra.mxu0 %v3806_v8  ;;  %1046 = vmatpush2.bf16.msra.mxu1 %v3808_v10  ;;  %v4292_v8 = vld [vmem:[#allocation6 + $0x300] ss:$16 sps:$4 sm:$0xff]   ;;  %v4300_v10 = vld [vmem:[#allocation6 + $0x6e4] ss:$16 sps:$4 sm:$0xff]  }
  0xad   :  { %2781 = vmatprep.subr.bf16.mxu0 %v4201_v7  ;;  %2824 = vmatprep.subr.bf16.mxu1 %v4204_v9  ;;  %v4289_v7 = vld [vmem:[#allocation6 + $0x100] ss:$16 sps:$4 sm:$0xff]   ;;  %v4297_v9 = vld [vmem:[#allocation6 + $0x4e4] ss:$16 sps:$4 sm:$0xff]  }
  0xaf   :  { %1005 = vmatmul.mubr.bf16.vlgmr.msra.gmra.mxu0 %v4836_v15  ;;  %1048 = vmatmul.mubr.bf16.vlgmr.msra.gmra.mxu1 %v4836_v15  ;;  %v4225_v15 = vld [vmem:[#allocation6 + $0x64] ss:$16 sps:$4 sm:$0xff]  }
  0xb0   :  { %2782 = vmatpush1.bf16.msra.mxu0 %v4199_v11  ;;  %2825 = vmatpush1.bf16.msra.mxu1 %v4202_v12  ;;  %v1111_v11 = vlaneseq }
  0xb1   :  { %2783 = vmatprep.subr.bf16.mxu0 %v4207_v13  ;;  %2826 = vmatprep.subr.bf16.mxu1 %v4210_v14  ;;  %v4852_v14 = vld [vmem:[%s4946_s2] sm:$0xff] }
  0xb2   :  { %v4844_v12 = vshrl.u32 %v1111_v11, 7  ;;  %v4322_v11 = vld [vmem:[#allocation6 + $0x660] ss:$16 sps:$4 sm:$0xff]  }
  0xb4   :  { %2784 = vmatpush1.bf16.msra.mxu0 %v4205_v16  ;;  %2827 = vmatpush1.bf16.msra.mxu1 %v4208_v17  ;;  %v4847_v13 = vsub.s32 0, %v4844_v12  ;;  %v4855_v16 = vsub.s32 1, %v4844_v12  ;;  %v1125_v17 = vsub.s32 3, %v4844_v12 }
  0xb5   :  { %2785 = vmatprep.subr.bf16.mxu0 %v4213_v18  ;;  %2828 = vmatprep.subr.bf16.mxu1 %v4216_v19  ;;  %v1121_v18 = vsub.s32 2, %v4844_v12 }
  0xb6   :  { %v1114_v19 = vrot.slane %v4852_v14, %v4847_v13 }
  0xb8   :  { %2786 = vmatpush1.bf16.msra.mxu0 %v4211_v20  ;;  %2829 = vmatpush1.bf16.msra.mxu1 %v4214_v21  ;;  %v1118_v20 = vrot.slane %v4852_v14, %v4855_v16 }
  0xb9   :  { %2787 = vmatprep.subr.bf16.mxu0 %v4219_v22  ;;  %2830 = vmatprep.subr.bf16.mxu1 %v4222_v23  ;;  %v1126_v22 = vrot.slane %v4852_v14, %v1125_v17 }
  0xbc   :  { %2788 = vmatpush1.bf16.msra.mxu0 %v4217_v24  ;;  %2831 = vmatpush1.bf16.msra.mxu1 %v4220_v25  ;;  %v1122_v24 = vrot.slane %v4852_v14, %v1121_v18 }
  0xbd   :  { %2789 = vmatprep.subr.bf16.mxu0 %v4225_v15  ;;  %2832 = vmatprep.subr.bf16.mxu1 %v4228_v26 }
  0xc0   :  { %2790 = vmatpush1.bf16.msra.mxu0 %v4223_v27  ;;  %2833 = vmatpush1.bf16.msra.mxu1 %v4226_v28 }
  0xc1   :  { %2791 = vmatprep.subr.bf16.mxu0 %v4231_v29  ;;  %2834 = vmatprep.subr.bf16.mxu1 %v4234_v30 }
  0xc4   :  { %2792 = vmatpush1.bf16.msra.mxu0 %v4229_v31  ;;  %2835 = vmatpush1.bf16.msra.mxu1 %v4232_v32 }
  0xc5   :  { %2793 = vmatprep.subr.bf16.mxu0 %v4237_v33  ;;  %2836 = vmatprep.subr.bf16.mxu1 %v4240_v34 }
  0xc8   :  { %2794 = vmatpush1.bf16.msra.mxu0 %v4235_v35  ;;  %2837 = vmatpush1.bf16.msra.mxu1 %v4238_v36 }
  0xc9   :  { %2795 = vmatprep.subr.bf16.mxu0 %v4243_v37  ;;  %2838 = vmatprep.subr.bf16.mxu1 %v4246_v38 }
  0xcc   :  { %2796 = vmatpush1.bf16.msra.mxu0 %v4241_v39  ;;  %2839 = vmatpush1.bf16.msra.mxu1 %v4244_v40 }
  0xcd   :  { %2797 = vmatprep.subr.bf16.mxu0 %v4249_v41  ;;  %2840 = vmatprep.subr.bf16.mxu1 %v4252_v42 }
  0xd0   :  { %2798 = vmatpush2.bf16.msra.mxu0 %v4247_v43  ;;  %2841 = vmatpush2.bf16.msra.mxu1 %v4250_v44 }
  0xd1   :  { %2799 = vmatprep.subr.bf16.mxu0 %v4255_v45  ;;  %2842 = vmatprep.subr.bf16.mxu1 %v4258_v59 }
  0xd4   :  { %2800 = vmatpush2.bf16.msra.mxu0 %v4253_v46  ;;  %2843 = vmatpush2.bf16.msra.mxu1 %v4256_v47 }
  0xd5   :  { %2801 = vmatprep.subr.bf16.mxu0 %v4261_v48  ;;  %2844 = vmatprep.subr.bf16.mxu1 %v4264_v49 }
  0xd8   :  { %2802 = vmatpush2.bf16.msra.mxu0 %v4259_v50  ;;  %2845 = vmatpush2.bf16.msra.mxu1 %v4262_v51 }
  0xd9   :  { %2803 = vmatprep.subr.bf16.mxu0 %v4267_v52  ;;  %2846 = vmatprep.subr.bf16.mxu1 %v4270_v53  ;;  %v4295_v53 = vld [vmem:[#allocation6 + $0x4e0] ss:$16 sps:$4 sm:$0xff]  }
  0xdc   :  { %2804 = vmatpush2.bf16.msra.mxu0 %v4265_v54  ;;  %2847 = vmatpush2.bf16.msra.mxu1 %v4268_v55 }
  0xdd   :  { %2805 = vmatprep.subr.bf16.mxu0 %v4273_v56  ;;  %2848 = vmatprep.subr.bf16.mxu1 %v4276_v57  ;;  %v4298_v57 = vld [vmem:[#allocation6 + $0x6e0] ss:$16 sps:$4 sm:$0xff]  }
  0xe0   :  { %2806 = vmatpush2.bf16.msra.mxu0 %v4271_v58  ;;  %2849 = vmatpush2.bf16.msra.mxu1 %v4274_v60  ;;  %v4303_v58 = vld [vmem:[#allocation6 + $0x4c4] ss:$16 sps:$4 sm:$0xff]  }
  0xe1   :  { %2807 = vmatprep.subr.bf16.mxu0 %v4279_v61  ;;  %2850 = vmatprep.subr.bf16.mxu1 %v4282_v62  ;;  %v4306_v61 = vld [vmem:[#allocation6 + $0x6c4] ss:$16 sps:$4 sm:$0xff]   ;;  %v4301_v62 = vld [vmem:[#allocation6 + $0x4c0] ss:$16 sps:$4 sm:$0xff]  }
  0xe4   :  { %2808 = vmatpush2.bf16.msra.mxu0 %v4277_v63  ;;  %2851 = vmatpush2.bf16.msra.mxu1 %v4280_v0  ;;  %v4304_v63 = vld [vmem:[#allocation6 + $0x6c0] ss:$16 sps:$4 sm:$0xff]   ;;  %v4309_v0 = vld [vmem:[#allocation6 + $0x4a4] ss:$16 sps:$4 sm:$0xff]  }
  0xe5   :  { %2809 = vmatprep.subr.bf16.mxu0 %v4285_v1  ;;  %2852 = vmatprep.subr.bf16.mxu1 %v4288_v2  ;;  %v4312_v1 = vld [vmem:[#allocation6 + $0x6a4] ss:$16 sps:$4 sm:$0xff]   ;;  %v4307_v2 = vld [vmem:[#allocation6 + $0x4a0] ss:$16 sps:$4 sm:$0xff]  }
  0xe8   :  { %2810 = vmatpush2.bf16.msra.mxu0 %v4283_v3  ;;  %2853 = vmatpush2.bf16.msra.mxu1 %v4286_v4  ;;  %v4310_v3 = vld [vmem:[#allocation6 + $0x6a0] ss:$16 sps:$4 sm:$0xff]   ;;  %v4315_v4 = vld [vmem:[#allocation6 + $0x484] ss:$16 sps:$4 sm:$0xff]  }
  0xe9   :  { %2811 = vmatprep.subr.bf16.mxu0 %v4291_v5  ;;  %2854 = vmatprep.subr.bf16.mxu1 %v4294_v6  ;;  %v4318_v5 = vld [vmem:[#allocation6 + $0x684] ss:$16 sps:$4 sm:$0xff]   ;;  %v4313_v6 = vld [vmem:[#allocation6 + $0x480] ss:$16 sps:$4 sm:$0xff]  }
  0xec   :  { %2812 = vmatpush2.bf16.msra.mxu0 %v4289_v7  ;;  %2855 = vmatpush2.bf16.msra.mxu1 %v4292_v8  ;;  %v4316_v7 = vld [vmem:[#allocation6 + $0x680] ss:$16 sps:$4 sm:$0xff]   ;;  %v4321_v8 = vld [vmem:[#allocation6 + $0x464] ss:$16 sps:$4 sm:$0xff]  }
  0xed   :  { %2867 = vmatprep.subr.bf16.mxu0 %v4297_v9  ;;  %2910 = vmatprep.subr.bf16.mxu1 %v4300_v10  ;;  %v4324_v9 = vld [vmem:[#allocation6 + $0x664] ss:$16 sps:$4 sm:$0xff]   ;;  %v4319_v10 = vld [vmem:[#allocation6 + $0x460] ss:$16 sps:$4 sm:$0xff]  }
 0x12f   :  { %v920_v21 = vpop.f32.mrf.mxu0  ;;  %v963_v23 = vpop.f32.mrf.mxu1 }
 0x130   :  { %v1151_v25 = vadd.f32 %v1114_v19, %v920_v21  ;;  %v1153_v30 = vadd.f32 %v1122_v24, %v963_v23  ;;  %v4325_v21 = vld [vmem:[#allocation6 + $0x440] ss:$16 sps:$4 sm:$0xff]   ;;  %v4333_v23 = vld [vmem:[#allocation6 + $0x424] ss:$16 sps:$4 sm:$0xff]  }
 0x131   :  { %v922_v15 = vpop.f32.mrf.mxu0  ;;  %v965_v27 = vpop.f32.mrf.mxu1 }
 0x132   :  { %v1152_v26 = vadd.f32 %v1118_v20, %v922_v15  ;;  %v1154_v28 = vadd.f32 %v1126_v22, %v965_v27  ;;  %vm1167_vm0 = vcmp.gt.f32.partialorder %v1151_v25, 0.0  ;;  %v1183_v33 = vmul.f32 0.2, %v1151_v25  ;;  %v4334_v15 = vld [vmem:[#allocation6 + $0x620] ss:$16 sps:$4 sm:$0xff]  }
 0x133   :  { %v924_v29 = vpop.f32.mrf.mxu0  ;;  %v967_v32 = vpop.f32.mrf.mxu1  ;;  %v1185_v43 = vmul.f32 0.2, %v1153_v30  ;;  %vm1169_vm6 = vcmp.gt.f32.partialorder %v1153_v30, 0.0  ;;  %v4342_v27 = vld [vmem:[#allocation6 + $0x604] ss:$16 sps:$4 sm:$0xff]  }
 0x134   :  { %v1159_v31 = vadd.f32 %v1114_v19, %v924_v29  ;;  %vm1168_vm1 = vcmp.gt.f32.partialorder %v1152_v26, 0.0  ;;  %v1161_v34 = vadd.f32 %v1122_v24, %v967_v32  ;;  %v1184_v36 = vmul.f32 0.2, %v1152_v26  ;;  %v4327_v19 = vld [vmem:[#allocation6 + $0x444] ss:$16 sps:$4 sm:$0xff]  }
 0x135   :  { %v926_v35 = vpop.f32.mrf.mxu0  ;;  %v969_v39 = vpop.f32.mrf.mxu1  ;;  %v1186_v40 = vmul.f32 0.2, %v1154_v28  ;;  %vm1170_vm4 = vcmp.gt.f32.partialorder %v1154_v28, 0.0  ;;  %v1199_v49 = vsel %vm1167_vm0, %v1151_v25, %v1183_v33  ;;  %v1201_v54 = vsel %vm1169_vm6, %v1153_v30, %v1185_v43  ;;  %v4336_v24 = vld [vmem:[#allocation6 + $0x624] ss:$16 sps:$4 sm:$0xff]  }
 0x136   :  { %vm1175_vm2 = vcmp.gt.f32.partialorder %v1159_v31, 0.0  ;;  %v1191_v37 = vmul.f32 0.2, %v1159_v31  ;;  %v1160_v38 = vadd.f32 %v1118_v20, %v926_v35  ;;  %vm1177_vm3 = vcmp.gt.f32.partialorder %v1161_v34, 0.0  ;;  %v4330_v20 = vld [vmem:[#allocation6 + $0x644] ss:$16 sps:$4 sm:$0xff]  }
 0x137   :  { %v1193_v41 = vmul.f32 0.2, %v1161_v34  ;;  %v1162_v42 = vadd.f32 %v1126_v22, %v969_v39  ;;  %v1200_v47 = vsel %vm1168_vm1, %v1152_v26, %v1184_v36  ;;  %v1202_v51 = vsel %vm1170_vm4, %v1154_v28, %v1186_v40  ;;  %v4328_v22 = vld [vmem:[#allocation6 + $0x640] ss:$16 sps:$4 sm:$0xff]   ;;  %v4339_v26 = vld [vmem:[#allocation6 + $0x404] ss:$16 sps:$4 sm:$0xff]  }
 0x138   :  { %vm1176_vm5 = vcmp.gt.f32.partialorder %v1160_v38, 0.0  ;;  %v1192_v44 = vmul.f32 0.2, %v1160_v38  ;;  %v1207_v45 = vsel %vm1175_vm2, %v1159_v31, %v1191_v37  ;;  %v4331_v25 = vld [vmem:[#allocation6 + $0x420] ss:$16 sps:$4 sm:$0xff]  }
 0x139   :  { %vm1178_vm7 = vcmp.gt.f32.partialorder %v1162_v42, 0.0  ;;  %v1194_v59 = vmul.f32 0.2, %v1162_v42  ;;  %v1209_v46 = vsel %vm1177_vm3, %v1161_v34, %v1193_v41  ;;  %v4873_v55 = vpack.c.bf16 %v1207_v45, %v1199_v49  ;;  %v4337_v28 = vld [vmem:[#allocation6 + $0x400] ss:$16 sps:$4 sm:$0xff]  }
 0x13a   :  { %v1208_v48 = vsel %vm1176_vm5, %v1160_v38, %v1192_v44  ;;  %v4877_v60 = vpack.c.bf16 %v1209_v46, %v1201_v54  ;;  %v4340_v29 = vld [vmem:[#allocation6 + $0x600] ss:$16 sps:$4 sm:$0xff]   ;;  %v4345_v30 = vld [vmem:[#allocation6 + $0x5e4] ss:$16 sps:$4 sm:$0xff]  }
 0x13b   :  { %v4871_v50 = vpack.c.bf16 %v1208_v48, %v1200_v47  ;;  %v1210_v52 = vsel %vm1178_vm7, %v1162_v42, %v1194_v59  ;;  %v4348_v31 = vld [vmem:[#allocation6 + $0x7e4] ss:$16 sps:$4 sm:$0xff]   ;;  %v4343_v32 = vld [vmem:[#allocation6 + $0x5e0] ss:$16 sps:$4 sm:$0xff]   ;;  %v1129_v47 = vsub.s32 4, %v4844_v12  ;;  %v1133_v48 = vsub.s32 5, %v4844_v12 }
 0x13c   :  { %v4875_v56 = vpack.c.bf16 %v1210_v52, %v1202_v51  ;;  %v4346_v33 = vld [vmem:[#allocation6 + $0x7e0] ss:$16 sps:$4 sm:$0xff]   ;;  %v4351_v34 = vld [vmem:[#allocation6 + $0x5c4] ss:$16 sps:$4 sm:$0xff]   ;;  %v1141_v51 = vsub.s32 7, %v4844_v12 }
 0x13d   :  { %2813 = vmatprep.mubr.bf16.mxu0 %v4871_v50  ;;  %v4354_v35 = vld [vmem:[#allocation6 + $0x7c4] ss:$16 sps:$4 sm:$0xff]   ;;  %v4349_v36 = vld [vmem:[#allocation6 + $0x5c0] ss:$16 sps:$4 sm:$0xff]  }
 0x13e   :  { %2856 = vmatprep.mubr.bf16.mxu1 %v4875_v56  ;;  %2814 = vmatmul.mubr.bf16.vlgmr.msra.gmra.mxu0 %v4873_v55  ;;  %v4352_v37 = vld [vmem:[#allocation6 + $0x7c0] ss:$16 sps:$4 sm:$0xff]   ;;  %v4357_v38 = vld [vmem:[#allocation6 + $0x5a4] ss:$16 sps:$4 sm:$0xff]  }
 0x13f   :  { %2857 = vmatmul.mubr.bf16.vlgmr.msra.gmra.mxu1 %v4877_v60  ;;  %2868 = vmatpush1.bf16.msra.mxu0 %v4295_v53  ;;  %v4360_v39 = vld [vmem:[#allocation6 + $0x7a4] ss:$16 sps:$4 sm:$0xff]   ;;  %v4355_v40 = vld [vmem:[#allocation6 + $0x5a0] ss:$16 sps:$4 sm:$0xff]   ;;  %v1137_v53 = vsub.s32 6, %v4844_v12 }
 0x140   :  { %2911 = vmatpush1.bf16.msra.mxu1 %v4298_v57  ;;  %2869 = vmatprep.subr.bf16.mxu0 %v4303_v58  ;;  %v4358_v41 = vld [vmem:[#allocation6 + $0x7a0] ss:$16 sps:$4 sm:$0xff]   ;;  %v4363_v42 = vld [vmem:[#allocation6 + $0x584] ss:$16 sps:$4 sm:$0xff]   ;;  %v1130_v57 = vrot.slane %v4852_v14, %v1129_v47 }
 0x141   :  { %2912 = vmatprep.subr.bf16.mxu1 %v4306_v61  ;;  %v4366_v43 = vld [vmem:[#allocation6 + $0x784] ss:$16 sps:$4 sm:$0xff]   ;;  %v4361_v44 = vld [vmem:[#allocation6 + $0x580] ss:$16 sps:$4 sm:$0xff]   ;;  %v1134_v61 = vrot.slane %v4852_v14, %v1133_v48  ;;  %v4391_v48 = vld [vmem:[#allocation6 + $0xe8] ss:$16 sps:$4 sm:$0xff]  }
 0x142   :  { %v4364_v45 = vld [vmem:[#allocation6 + $0x780] ss:$16 sps:$4 sm:$0xff]   ;;  %v4369_v59 = vld [vmem:[#allocation6 + $0x564] ss:$16 sps:$4 sm:$0xff]  }
 0x143   :  { %2870 = vmatpush1.bf16.msra.mxu0 %v4301_v62  ;;  %v4372_v46 = vld [vmem:[#allocation6 + $0x764] ss:$16 sps:$4 sm:$0xff]   ;;  %v4367_v49 = vld [vmem:[#allocation6 + $0x560] ss:$16 sps:$4 sm:$0xff]  }
 0x144   :  { %2913 = vmatpush1.bf16.msra.mxu1 %v4304_v63  ;;  %2871 = vmatprep.subr.bf16.mxu0 %v4309_v0  ;;  %v4370_v52 = vld [vmem:[#allocation6 + $0x760] ss:$16 sps:$4 sm:$0xff]   ;;  %v4375_v54 = vld [vmem:[#allocation6 + $0x544] ss:$16 sps:$4 sm:$0xff]   ;;  %v1142_v63 = vrot.slane %v4852_v14, %v1141_v51 }
 0x145   :  { %2914 = vmatprep.subr.bf16.mxu1 %v4312_v1  ;;  %v4378_v58 = vld [vmem:[#allocation6 + $0x744] ss:$16 sps:$4 sm:$0xff]   ;;  %v4373_v0 = vld [vmem:[#allocation6 + $0x540] ss:$16 sps:$4 sm:$0xff]  }
 0x147   :  { %2872 = vmatpush1.bf16.msra.mxu0 %v4307_v2  ;;  %v1138_v2 = vrot.slane %v4852_v14, %v1137_v53  ;;  %v4387_v14 = vld [vmem:[#allocation6 + $0x504] ss:$16 sps:$4 sm:$0xff]   ;;  %v4394_v53 = vld [vmem:[#allocation6 + $0x2e8] ss:$16 sps:$4 sm:$0xff]  }
 0x148   :  { %2915 = vmatpush1.bf16.msra.mxu1 %v4310_v3  ;;  %2873 = vmatprep.subr.bf16.mxu0 %v4315_v4  ;;  %v4376_v3 = vld [vmem:[#allocation6 + $0x740] ss:$16 sps:$4 sm:$0xff]   ;;  %v4381_v4 = vld [vmem:[#allocation6 + $0x524] ss:$16 sps:$4 sm:$0xff]  }
 0x149   :  { %2916 = vmatprep.subr.bf16.mxu1 %v4318_v5 }
 0x14b   :  { %2874 = vmatpush1.bf16.msra.mxu0 %v4313_v6 }
 0x14c   :  { %2917 = vmatpush1.bf16.msra.mxu1 %v4316_v7  ;;  %2875 = vmatprep.subr.bf16.mxu0 %v4321_v8  ;;  %v4384_v7 = vld [vmem:[#allocation6 + $0x724] ss:$16 sps:$4 sm:$0xff]  }
 0x14d   :  { %2918 = vmatprep.subr.bf16.mxu1 %v4324_v9 }
 0x14f   :  { %2876 = vmatpush1.bf16.msra.mxu0 %v4319_v10 }
 0x150   :  { %2919 = vmatpush1.bf16.msra.mxu1 %v4322_v11  ;;  %2877 = vmatprep.subr.bf16.mxu0 %v4327_v19  ;;  %v4379_v19 = vld [vmem:[#allocation6 + $0x520] ss:$16 sps:$4 sm:$0xff]  }
 0x151   :  { %2920 = vmatprep.subr.bf16.mxu1 %v4330_v20 }
 0x153   :  { %2878 = vmatpush1.bf16.msra.mxu0 %v4325_v21 }
 0x154   :  { %2921 = vmatpush1.bf16.msra.mxu1 %v4328_v22  ;;  %2879 = vmatprep.subr.bf16.mxu0 %v4333_v23  ;;  %v4382_v23 = vld [vmem:[#allocation6 + $0x720] ss:$16 sps:$4 sm:$0xff]  }
 0x155   :  { %2922 = vmatprep.subr.bf16.mxu1 %v4336_v24  ;;  %v4390_v24 = vld [vmem:[#allocation6 + $0x704] ss:$16 sps:$4 sm:$0xff]  }
 0x157   :  { %2880 = vmatpush1.bf16.msra.mxu0 %v4331_v25 }
 0x158   :  { %2923 = vmatpush1.bf16.msra.mxu1 %v4334_v15  ;;  %2881 = vmatprep.subr.bf16.mxu0 %v4339_v26 }
 0x159   :  { %2924 = vmatprep.subr.bf16.mxu1 %v4342_v27  ;;  %v4385_v27 = vld [vmem:[#allocation6 + $0x500] ss:$16 sps:$4 sm:$0xff]  }
 0x15b   :  { %2882 = vmatpush1.bf16.msra.mxu0 %v4337_v28 }
 0x15c   :  { %2925 = vmatpush1.bf16.msra.mxu1 %v4340_v29  ;;  %2883 = vmatprep.subr.bf16.mxu0 %v4345_v30 }
 0x15d   :  { %2926 = vmatprep.subr.bf16.mxu1 %v4348_v31 }
 0x15f   :  { %2884 = vmatpush2.bf16.msra.mxu0 %v4343_v32  ;;  %v4388_v32 = vld [vmem:[#allocation6 + $0x700] ss:$16 sps:$4 sm:$0xff]  }
 0x160   :  { %2927 = vmatpush2.bf16.msra.mxu1 %v4346_v33  ;;  %2885 = vmatprep.subr.bf16.mxu0 %v4351_v34  ;;  %v4393_v33 = vld [vmem:[#allocation6 + $0xec] ss:$16 sps:$4 sm:$0xff]  }
 0x161   :  { %2928 = vmatprep.subr.bf16.mxu1 %v4354_v35 }
 0x163   :  { %2886 = vmatpush2.bf16.msra.mxu0 %v4349_v36 }
 0x164   :  { %2929 = vmatpush2.bf16.msra.mxu1 %v4352_v37  ;;  %2887 = vmatprep.subr.bf16.mxu0 %v4357_v38 }
 0x165   :  { %2930 = vmatprep.subr.bf16.mxu1 %v4360_v39 }
 0x167   :  { %2888 = vmatpush2.bf16.msra.mxu0 %v4355_v40 }
 0x168   :  { %2931 = vmatpush2.bf16.msra.mxu1 %v4358_v41  ;;  %2889 = vmatprep.subr.bf16.mxu0 %v4363_v42  ;;  %v4396_v41 = vld [vmem:[#allocation6 + $0x2ec] ss:$16 sps:$4 sm:$0xff]  }
 0x169   :  { %2932 = vmatprep.subr.bf16.mxu1 %v4366_v43 }
 0x16b   :  { %2890 = vmatpush2.bf16.msra.mxu0 %v4361_v44 }
 0x16c   :  { %2933 = vmatpush2.bf16.msra.mxu1 %v4364_v45  ;;  %2891 = vmatprep.subr.bf16.mxu0 %v4369_v59 }
 0x16d   :  { %2934 = vmatprep.subr.bf16.mxu1 %v4372_v46 }
 0x16f   :  { %2892 = vmatpush2.bf16.msra.mxu0 %v4367_v49  ;;  %v1006_v62 = vpop.f32.mrf.mxu0  ;;  %v1049_v1 = vpop.f32.mrf.mxu1 }
 0x170   :  { %2935 = vmatpush2.bf16.msra.mxu1 %v4370_v52  ;;  %2893 = vmatprep.subr.bf16.mxu0 %v4375_v54  ;;  %v1155_v5 = vadd.f32 %v1130_v57, %v1006_v62  ;;  %v1157_v20 = vadd.f32 %v1138_v2, %v1049_v1  ;;  %v4400_v62 = vld [vmem:[#allocation6 + $0x2c8] ss:$16 sps:$4 sm:$0xff]  }
 0x171   :  { %v1008_v6 = vpop.f32.mrf.mxu0  ;;  %2936 = vmatprep.subr.bf16.mxu1 %v4378_v58  ;;  %v1051_v9 = vpop.f32.mrf.mxu1  ;;  %v4402_v58 = vld [vmem:[#allocation6 + $0x2cc] ss:$16 sps:$4 sm:$0xff]   ;;  %v4403_v1 = vld [vmem:[#allocation6 + $0xa8] ss:$16 sps:$4 sm:$0xff]  }
 0x172   :  { %v1156_v8 = vadd.f32 %v1134_v61, %v1008_v6  ;;  %v1158_v10 = vadd.f32 %v1142_v63, %v1051_v9  ;;  %vm1171_vm8 = vcmp.gt.f32.partialorder %v1155_v5, 0.0  ;;  %v1187_v25 = vmul.f32 0.2, %v1155_v5  ;;  %v4417_v6 = vld [vmem:[#allocation6 + $0x6c] ss:$16 sps:$4 sm:$0xff]  }
 0x173   :  { %2894 = vmatpush2.bf16.msra.mxu0 %v4373_v0  ;;  %v1010_v11 = vpop.f32.mrf.mxu0  ;;  %v1053_v22 = vpop.f32.mrf.mxu1  ;;  %v1189_v37 = vmul.f32 0.2, %v1157_v20  ;;  %vm1173_vm14 = vcmp.gt.f32.partialorder %v1157_v20, 0.0  ;;  %v4408_v0 = vld [vmem:[#allocation6 + $0x2ac] ss:$16 sps:$4 sm:$0xff]  }
 0x174   :  { %2937 = vmatpush2.bf16.msra.mxu1 %v4376_v3  ;;  %v1163_v21 = vadd.f32 %v1130_v57, %v1010_v11  ;;  %2895 = vmatprep.subr.bf16.mxu0 %v4381_v4  ;;  %vm1172_vm9 = vcmp.gt.f32.partialorder %v1156_v8, 0.0  ;;  %v1165_v15 = vadd.f32 %v1138_v2, %v1053_v22  ;;  %v1188_v28 = vmul.f32 0.2, %v1156_v8  ;;  %v4399_v57 = vld [vmem:[#allocation6 + $0xcc] ss:$16 sps:$4 sm:$0xff]  }
 0x175   :  { %v1012_v26 = vpop.f32.mrf.mxu0  ;;  %2938 = vmatprep.subr.bf16.mxu1 %v4384_v7  ;;  %v1055_v31 = vpop.f32.mrf.mxu1  ;;  %v1190_v34 = vmul.f32 0.2, %v1158_v10  ;;  %vm1174_vm12 = vcmp.gt.f32.partialorder %v1158_v10, 0.0  ;;  %v1203_v45 = vsel %vm1171_vm8, %v1155_v5, %v1187_v25  ;;  %v1205_v49 = vsel %vm1173_vm14, %v1157_v20, %v1189_v37  ;;  %v4406_v2 = vld [vmem:[#allocation6 + $0x2a8] ss:$16 sps:$4 sm:$0xff]  }
 0x176   :  { %vm1179_vm10 = vcmp.gt.f32.partialorder %v1163_v21, 0.0  ;;  %v1195_v29 = vmul.f32 0.2, %v1163_v21  ;;  %v1164_v30 = vadd.f32 %v1134_v61, %v1012_v26  ;;  %vm1181_vm11 = vcmp.gt.f32.partialorder %v1165_v15, 0.0  ;;  %v4397_v61 = vld [vmem:[#allocation6 + $0xc8] ss:$16 sps:$4 sm:$0xff]  }
 0x177   :  { %v1197_v35 = vmul.f32 0.2, %v1165_v15  ;;  %v1166_v36 = vadd.f32 %v1142_v63, %v1055_v31  ;;  %2896 = vmatpush2.bf16.msra.mxu0 %v4379_v19  ;;  %v1204_v43 = vsel %vm1172_vm9, %v1156_v8, %v1188_v28  ;;  %v1206_v46 = vsel %vm1174_vm12, %v1158_v10, %v1190_v34  ;;  %v4405_v63 = vld [vmem:[#allocation6 + $0xac] ss:$16 sps:$4 sm:$0xff]   ;;  %v4409_v5 = vld [vmem:[#allocation6 + $0x88] ss:$16 sps:$4 sm:$0xff]  }
 0x178   :  { %vm1180_vm13 = vcmp.gt.f32.partialorder %v1164_v30, 0.0  ;;  %v1196_v38 = vmul.f32 0.2, %v1164_v30  ;;  %2939 = vmatpush2.bf16.msra.mxu1 %v4382_v23  ;;  %2897 = vmatprep.subr.bf16.mxu0 %v4387_v14  ;;  %v1211_v39 = vsel %vm1179_vm10, %v1163_v21, %v1195_v29  ;;  %v4411_v3 = vld [vmem:[#allocation6 + $0x8c] ss:$16 sps:$4 sm:$0xff]   ;;  %vm3730_vm12 = vcmask 122880  }
 0x179   :  { %vm1182_vm15 = vcmp.gt.f32.partialorder %v1166_v36, 0.0  ;;  %v1198_v40 = vmul.f32 0.2, %v1166_v36  ;;  %2940 = vmatprep.subr.bf16.mxu1 %v4390_v24  ;;  %v1213_v42 = vsel %vm1181_vm11, %v1165_v15, %v1197_v35  ;;  %v4898_v51 = vpack.c.bf16 %v1211_v39, %v1203_v45  ;;  %v4414_v4 = vld [vmem:[#allocation6 + $0x28c] ss:$16 sps:$4 sm:$0xff]  }
 0x17a   :  { %v1212_v44 = vsel %vm1180_vm13, %v1164_v30, %v1196_v38  ;;  %v4902_v54 = vpack.c.bf16 %v1213_v42, %v1205_v49  ;;  %v4420_v7 = vld [vmem:[#allocation6 + $0x26c] ss:$16 sps:$4 sm:$0xff]   ;;  %v4418_v8 = vld [vmem:[#allocation6 + $0x268] ss:$16 sps:$4 sm:$0xff]  }
 0x17b   :  { %2898 = vmatpush2.bf16.msra.mxu0 %v4385_v27  ;;  %v4895_v59 = vpack.c.bf16 %v1212_v44, %v1204_v43  ;;  %v1214_v47 = vsel %vm1182_vm15, %v1166_v36, %v1198_v40  ;;  %v4423_v9 = vld [vmem:[#allocation6 + $0x4c] ss:$16 sps:$4 sm:$0xff]   ;;  %v4421_v11 = vld [vmem:[#allocation6 + $0x48] ss:$16 sps:$4 sm:$0xff]  }
 0x17c   :  { %2941 = vmatpush2.bf16.msra.mxu1 %v4388_v32  ;;  %v4900_v52 = vpack.c.bf16 %v1214_v47, %v1206_v46  ;;  %2953 = vmatprep.subr.bf16.mxu0 %v4393_v33  ;;  %v4426_v10 = vld [vmem:[#allocation6 + $0x24c] ss:$16 sps:$4 sm:$0xff]   ;;  %v4424_v19 = vld [vmem:[#allocation6 + $0x248] ss:$16 sps:$4 sm:$0xff]  }
 0x17d   :  { %2899 = vmatprep.mubr.bf16.mxu0 %v4895_v59  ;;  %2996 = vmatprep.subr.bf16.mxu1 %v4396_v41  ;;  %v4429_v20 = vld [vmem:[#allocation6 + $0x2c] ss:$16 sps:$4 sm:$0xff]   ;;  %v4427_v22 = vld [vmem:[#allocation6 + $0x28] ss:$16 sps:$4 sm:$0xff]  }
 0x17e   :  { %2942 = vmatprep.mubr.bf16.mxu1 %v4900_v52  ;;  %2900 = vmatmul.mubr.bf16.vlgmr.msra.gmra.mxu0 %v4898_v51  ;;  %v4432_v21 = vld [vmem:[#allocation6 + $0x22c] ss:$16 sps:$4 sm:$0xff]   ;;  %v4430_v23 = vld [vmem:[#allocation6 + $0x228] ss:$16 sps:$4 sm:$0xff]  }
 0x17f   :  { %2943 = vmatmul.mubr.bf16.vlgmr.msra.gmra.mxu1 %v4902_v54  ;;  %2954 = vmatpush1.bf16.msra.mxu0 %v4391_v48  ;;  %v4435_v14 = vld [vmem:[#allocation6 + $0xc] ss:$16 sps:$4 sm:$0xff]   ;;  %v4433_v25 = vld [vmem:[#allocation6 + $0x8] ss:$16 sps:$4 sm:$0xff]  }
 0x180   :  { %2997 = vmatpush1.bf16.msra.mxu1 %v4394_v53  ;;  %2985 = vmatprep.mubr.bf16.mxu0 %v4871_v50  ;;  %v4412_v50 = vld [vmem:[#allocation6 + $0x288] ss:$16 sps:$4 sm:$0xff]   ;;  %v4438_v24 = vld [vmem:[#allocation6 + $0x20c] ss:$16 sps:$4 sm:$0xff]  }
 0x181   :  { %3028 = vmatprep.mubr.bf16.mxu1 %v4875_v56  ;;  %2955 = vmatprep.subr.bf16.mxu0 %v4399_v57  ;;  %v4415_v56 = vld [vmem:[#allocation6 + $0x68] ss:$16 sps:$4 sm:$0xff]   ;;  %v4441_v26 = vld [vmem:[#allocation6 + $0x1ec] ss:$16 sps:$4 sm:$0xff]  }
 0x182   :  { %2998 = vmatprep.subr.bf16.mxu1 %v4402_v58  ;;  %v4436_v15 = vld [vmem:[#allocation6 + $0x208] ss:$16 sps:$4 sm:$0xff]   ;;  %v4444_v27 = vld [vmem:[#allocation6 + $0x3ec] ss:$16 sps:$4 sm:$0xff]  }
 0x183   :  { %2956 = vmatpush1.bf16.msra.mxu0 %v4397_v61  ;;  %v4439_v28 = vld [vmem:[#allocation6 + $0x1e8] ss:$16 sps:$4 sm:$0xff]   ;;  %v4447_v30 = vld [vmem:[#allocation6 + $0x1cc] ss:$16 sps:$4 sm:$0xff]  }
 0x184   :  { %2999 = vmatpush1.bf16.msra.mxu1 %v4400_v62  ;;  %2957 = vmatprep.subr.bf16.mxu0 %v4405_v63  ;;  %v4442_v29 = vld [vmem:[#allocation6 + $0x3e8] ss:$16 sps:$4 sm:$0xff]   ;;  %v4450_v31 = vld [vmem:[#allocation6 + $0x3cc] ss:$16 sps:$4 sm:$0xff]  }
 0x185   :  { %3000 = vmatprep.subr.bf16.mxu1 %v4408_v0  ;;  %v4445_v32 = vld [vmem:[#allocation6 + $0x1c8] ss:$16 sps:$4 sm:$0xff]   ;;  %v4453_v34 = vld [vmem:[#allocation6 + $0x1ac] ss:$16 sps:$4 sm:$0xff]  }
 0x186   :  { %v4448_v33 = vld [vmem:[#allocation6 + $0x3c8] ss:$16 sps:$4 sm:$0xff]   ;;  %v4456_v35 = vld [vmem:[#allocation6 + $0x3ac] ss:$16 sps:$4 sm:$0xff]  }
 0x187   :  { %2958 = vmatpush1.bf16.msra.mxu0 %v4403_v1  ;;  %v4451_v36 = vld [vmem:[#allocation6 + $0x1a8] ss:$16 sps:$4 sm:$0xff]   ;;  %v4459_v38 = vld [vmem:[#allocation6 + $0x18c] ss:$16 sps:$4 sm:$0xff]  }
 0x188   :  { %3001 = vmatpush1.bf16.msra.mxu1 %v4406_v2  ;;  %2959 = vmatprep.subr.bf16.mxu0 %v4411_v3  ;;  %v4454_v37 = vld [vmem:[#allocation6 + $0x3a8] ss:$16 sps:$4 sm:$0xff]   ;;  %v4462_v39 = vld [vmem:[#allocation6 + $0x38c] ss:$16 sps:$4 sm:$0xff]  }
 0x189   :  { %3002 = vmatprep.subr.bf16.mxu1 %v4414_v4  ;;  %v4457_v40 = vld [vmem:[#allocation6 + $0x188] ss:$16 sps:$4 sm:$0xff]   ;;  %v4465_v42 = vld [vmem:[#allocation6 + $0x16c] ss:$16 sps:$4 sm:$0xff]  }
 0x18a   :  { %v4460_v41 = vld [vmem:[#allocation6 + $0x388] ss:$16 sps:$4 sm:$0xff]   ;;  %v4468_v43 = vld [vmem:[#allocation6 + $0x36c] ss:$16 sps:$4 sm:$0xff]  }
 0x18b   :  { %2960 = vmatpush1.bf16.msra.mxu0 %v4409_v5  ;;  %v4463_v44 = vld [vmem:[#allocation6 + $0x168] ss:$16 sps:$4 sm:$0xff]   ;;  %v4471_v46 = vld [vmem:[#allocation6 + $0x14c] ss:$16 sps:$4 sm:$0xff]  }
 0x18c   :  { %3003 = vmatpush1.bf16.msra.mxu1 %v4412_v50  ;;  %2961 = vmatprep.subr.bf16.mxu0 %v4417_v6  ;;  %v4466_v45 = vld [vmem:[#allocation6 + $0x368] ss:$16 sps:$4 sm:$0xff]   ;;  %v4474_v47 = vld [vmem:[#allocation6 + $0x34c] ss:$16 sps:$4 sm:$0xff]  }
 0x18d   :  { %3004 = vmatprep.subr.bf16.mxu1 %v4420_v7  ;;  %v4469_v48 = vld [vmem:[#allocation6 + $0x148] ss:$16 sps:$4 sm:$0xff]   ;;  %v4477_v53 = vld [vmem:[#allocation6 + $0x12c] ss:$16 sps:$4 sm:$0xff]  }
 0x18e   :  { %v4472_v49 = vld [vmem:[#allocation6 + $0x348] ss:$16 sps:$4 sm:$0xff]   ;;  %v4480_v57 = vld [vmem:[#allocation6 + $0x32c] ss:$16 sps:$4 sm:$0xff]  }
 0x18f   :  { %2962 = vmatpush1.bf16.msra.mxu0 %v4415_v56  ;;  %v4475_v58 = vld [vmem:[#allocation6 + $0x128] ss:$16 sps:$4 sm:$0xff]   ;;  %v4483_v62 = vld [vmem:[#allocation6 + $0x10c] ss:$16 sps:$4 sm:$0xff]  }
 0x190   :  { %3005 = vmatpush1.bf16.msra.mxu1 %v4418_v8  ;;  %2963 = vmatprep.subr.bf16.mxu0 %v4423_v9  ;;  %v4478_v61 = vld [vmem:[#allocation6 + $0x328] ss:$16 sps:$4 sm:$0xff]   ;;  %v4486_v63 = vld [vmem:[#allocation6 + $0x30c] ss:$16 sps:$4 sm:$0xff]  }
 0x191   :  { %3006 = vmatprep.subr.bf16.mxu1 %v4426_v10  ;;  %v4481_v0 = vld [vmem:[#allocation6 + $0x108] ss:$16 sps:$4 sm:$0xff]   ;;  %v4489_v2 = vld [vmem:[#allocation6 + $0x4ec] ss:$16 sps:$4 sm:$0xff]  }
 0x192   :  { %v4484_v1 = vld [vmem:[#allocation6 + $0x308] ss:$16 sps:$4 sm:$0xff]   ;;  %v4492_v3 = vld [vmem:[#allocation6 + $0x6ec] ss:$16 sps:$4 sm:$0xff]  }
 0x193   :  { %2964 = vmatpush1.bf16.msra.mxu0 %v4421_v11  ;;  %v4487_v4 = vld [vmem:[#allocation6 + $0x4e8] ss:$16 sps:$4 sm:$0xff]   ;;  %v4495_v50 = vld [vmem:[#allocation6 + $0x4cc] ss:$16 sps:$4 sm:$0xff]  }
 0x194   :  { %3007 = vmatpush1.bf16.msra.mxu1 %v4424_v19  ;;  %2965 = vmatprep.subr.bf16.mxu0 %v4429_v20  ;;  %v4490_v5 = vld [vmem:[#allocation6 + $0x6e8] ss:$16 sps:$4 sm:$0xff]   ;;  %v4498_v6 = vld [vmem:[#allocation6 + $0x6cc] ss:$16 sps:$4 sm:$0xff]  }
 0x195   :  { %3008 = vmatprep.subr.bf16.mxu1 %v4432_v21  ;;  %v4493_v7 = vld [vmem:[#allocation6 + $0x4c8] ss:$16 sps:$4 sm:$0xff]   ;;  %v4501_v8 = vld [vmem:[#allocation6 + $0x4ac] ss:$16 sps:$4 sm:$0xff]  }
 0x196   :  { %v4496_v56 = vld [vmem:[#allocation6 + $0x6c8] ss:$16 sps:$4 sm:$0xff]   ;;  %v4504_v9 = vld [vmem:[#allocation6 + $0x6ac] ss:$16 sps:$4 sm:$0xff]  }
 0x197   :  { %2966 = vmatpush1.bf16.msra.mxu0 %v4427_v22  ;;  %v4499_v10 = vld [vmem:[#allocation6 + $0x4a8] ss:$16 sps:$4 sm:$0xff]   ;;  %v4507_v11 = vld [vmem:[#allocation6 + $0x48c] ss:$16 sps:$4 sm:$0xff]  }
 0x198   :  { %3009 = vmatpush1.bf16.msra.mxu1 %v4430_v23  ;;  %2967 = vmatprep.subr.bf16.mxu0 %v4435_v14  ;;  %v4505_v19 = vld [vmem:[#allocation6 + $0x488] ss:$16 sps:$4 sm:$0xff]   ;;  %v4513_v20 = vld [vmem:[#allocation6 + $0x46c] ss:$16 sps:$4 sm:$0xff]  }
 0x199   :  { %3010 = vmatprep.subr.bf16.mxu1 %v4438_v24  ;;  %v4516_v21 = vld [vmem:[#allocation6 + $0x66c] ss:$16 sps:$4 sm:$0xff]   ;;  %v4514_v22 = vld [vmem:[#allocation6 + $0x668] ss:$16 sps:$4 sm:$0xff]  }
 0x19a   :  { %v4519_v23 = vld [vmem:[#allocation6 + $0x44c] ss:$16 sps:$4 sm:$0xff]   ;;  %v4517_v24 = vld [vmem:[#allocation6 + $0x448] ss:$16 sps:$4 sm:$0xff]  }
 0x19b   :  { %2968 = vmatpush1.bf16.msra.mxu0 %v4433_v25  ;;  %v4522_v14 = vld [vmem:[#allocation6 + $0x64c] ss:$16 sps:$4 sm:$0xff]   ;;  %v4520_v25 = vld [vmem:[#allocation6 + $0x648] ss:$16 sps:$4 sm:$0xff]  }
 0x19c   :  { %3011 = vmatpush1.bf16.msra.mxu1 %v4436_v15  ;;  %2969 = vmatprep.subr.bf16.mxu0 %v4441_v26  ;;  %v4525_v15 = vld [vmem:[#allocation6 + $0x42c] ss:$16 sps:$4 sm:$0xff]  }
 0x19d   :  { %3012 = vmatprep.subr.bf16.mxu1 %v4444_v27  ;;  %v4528_v26 = vld [vmem:[#allocation6 + $0x62c] ss:$16 sps:$4 sm:$0xff]   ;;  %v4523_v27 = vld [vmem:[#allocation6 + $0x428] ss:$16 sps:$4 sm:$0xff]  }
 0x19f   :  { %2970 = vmatpush2.bf16.msra.mxu0 %v4439_v28  ;;  %v4526_v28 = vld [vmem:[#allocation6 + $0x628] ss:$16 sps:$4 sm:$0xff]  }
 0x1a0   :  { %3013 = vmatpush2.bf16.msra.mxu1 %v4442_v29  ;;  %2971 = vmatprep.subr.bf16.mxu0 %v4447_v30  ;;  %v4531_v29 = vld [vmem:[#allocation6 + $0x40c] ss:$16 sps:$4 sm:$0xff]  }
 0x1a1   :  { %3014 = vmatprep.subr.bf16.mxu1 %v4450_v31  ;;  %v4534_v30 = vld [vmem:[#allocation6 + $0x60c] ss:$16 sps:$4 sm:$0xff]   ;;  %v4529_v31 = vld [vmem:[#allocation6 + $0x408] ss:$16 sps:$4 sm:$0xff]  }
 0x1a3   :  { %2972 = vmatpush2.bf16.msra.mxu0 %v4445_v32  ;;  %v4532_v32 = vld [vmem:[#allocation6 + $0x608] ss:$16 sps:$4 sm:$0xff]  }
 0x1a4   :  { %3015 = vmatpush2.bf16.msra.mxu1 %v4448_v33  ;;  %2973 = vmatprep.subr.bf16.mxu0 %v4453_v34  ;;  %v4537_v33 = vld [vmem:[#allocation6 + $0x5ec] ss:$16 sps:$4 sm:$0xff]  }
 0x1a5   :  { %3016 = vmatprep.subr.bf16.mxu1 %v4456_v35  ;;  %v4540_v34 = vld [vmem:[#allocation6 + $0x7ec] ss:$16 sps:$4 sm:$0xff]   ;;  %v4535_v35 = vld [vmem:[#allocation6 + $0x5e8] ss:$16 sps:$4 sm:$0xff]  }
 0x1a7   :  { %2974 = vmatpush2.bf16.msra.mxu0 %v4451_v36  ;;  %v4538_v36 = vld [vmem:[#allocation6 + $0x7e8] ss:$16 sps:$4 sm:$0xff]  }
 0x1a8   :  { %3017 = vmatpush2.bf16.msra.mxu1 %v4454_v37  ;;  %2975 = vmatprep.subr.bf16.mxu0 %v4459_v38  ;;  %v4543_v37 = vld [vmem:[#allocation6 + $0x5cc] ss:$16 sps:$4 sm:$0xff]  }
 0x1a9   :  { %3018 = vmatprep.subr.bf16.mxu1 %v4462_v39  ;;  %v4546_v38 = vld [vmem:[#allocation6 + $0x7cc] ss:$16 sps:$4 sm:$0xff]   ;;  %v4541_v39 = vld [vmem:[#allocation6 + $0x5c8] ss:$16 sps:$4 sm:$0xff]  }
 0x1ab   :  { %2976 = vmatpush2.bf16.msra.mxu0 %v4457_v40  ;;  %v4544_v40 = vld [vmem:[#allocation6 + $0x7c8] ss:$16 sps:$4 sm:$0xff]  }
 0x1ac   :  { %3019 = vmatpush2.bf16.msra.mxu1 %v4460_v41  ;;  %2977 = vmatprep.subr.bf16.mxu0 %v4465_v42  ;;  %v4549_v41 = vld [vmem:[#allocation6 + $0x5ac] ss:$16 sps:$4 sm:$0xff]  }
 0x1ad   :  { %3020 = vmatprep.subr.bf16.mxu1 %v4468_v43  ;;  %v4552_v42 = vld [vmem:[#allocation6 + $0x7ac] ss:$16 sps:$4 sm:$0xff]   ;;  %v4547_v43 = vld [vmem:[#allocation6 + $0x5a8] ss:$16 sps:$4 sm:$0xff]  }
 0x1af   :  { %2978 = vmatpush2.bf16.msra.mxu0 %v4463_v44  ;;  %v4550_v44 = vld [vmem:[#allocation6 + $0x7a8] ss:$16 sps:$4 sm:$0xff]  }
 0x1b0   :  { %3021 = vmatpush2.bf16.msra.mxu1 %v4466_v45  ;;  %2979 = vmatprep.subr.bf16.mxu0 %v4471_v46  ;;  %v4555_v45 = vld [vmem:[#allocation6 + $0x58c] ss:$16 sps:$4 sm:$0xff]  }
 0x1b1   :  { %3022 = vmatprep.subr.bf16.mxu1 %v4474_v47  ;;  %v4558_v46 = vld [vmem:[#allocation6 + $0x78c] ss:$16 sps:$4 sm:$0xff]   ;;  %v4553_v47 = vld [vmem:[#allocation6 + $0x588] ss:$16 sps:$4 sm:$0xff]  }
 0x1b3   :  { %2980 = vmatpush2.bf16.msra.mxu0 %v4469_v48  ;;  %v4556_v48 = vld [vmem:[#allocation6 + $0x788] ss:$16 sps:$4 sm:$0xff]  }
 0x1b4   :  { %3023 = vmatpush2.bf16.msra.mxu1 %v4472_v49  ;;  %2981 = vmatprep.subr.bf16.mxu0 %v4477_v53  ;;  %v4561_v49 = vld [vmem:[#allocation6 + $0x56c] ss:$16 sps:$4 sm:$0xff]  }
 0x1b5   :  { %3024 = vmatprep.subr.bf16.mxu1 %v4480_v57  ;;  %v4564_v53 = vld [vmem:[#allocation6 + $0x76c] ss:$16 sps:$4 sm:$0xff]   ;;  %v4559_v57 = vld [vmem:[#allocation6 + $0x568] ss:$16 sps:$4 sm:$0xff]  }
 0x1b7   :  { %2982 = vmatpush2.bf16.msra.mxu0 %v4475_v58  ;;  %v4562_v58 = vld [vmem:[#allocation6 + $0x768] ss:$16 sps:$4 sm:$0xff]  }
 0x1b8   :  { %3025 = vmatpush2.bf16.msra.mxu1 %v4478_v61  ;;  %2983 = vmatprep.subr.bf16.mxu0 %v4483_v62  ;;  %v4567_v61 = vld [vmem:[#allocation6 + $0x54c] ss:$16 sps:$4 sm:$0xff]  }
 0x1b9   :  { %3026 = vmatprep.subr.bf16.mxu1 %v4486_v63  ;;  %v4570_v62 = vld [vmem:[#allocation6 + $0x74c] ss:$16 sps:$4 sm:$0xff]   ;;  %v4565_v63 = vld [vmem:[#allocation6 + $0x548] ss:$16 sps:$4 sm:$0xff]  }
 0x1bb   :  { %2984 = vmatpush2.bf16.msra.mxu0 %v4481_v0  ;;  %v4568_v0 = vld [vmem:[#allocation6 + $0x748] ss:$16 sps:$4 sm:$0xff]  }
 0x1bc   :  { %3027 = vmatpush2.bf16.msra.mxu1 %v4484_v1  ;;  %3039 = vmatprep.subr.bf16.mxu0 %v4489_v2  ;;  %v4573_v1 = vld [vmem:[#allocation6 + $0x52c] ss:$16 sps:$4 sm:$0xff]  }
 0x1bd   :  { %3082 = vmatprep.subr.bf16.mxu1 %v4492_v3  ;;  %v4576_v2 = vld [vmem:[#allocation6 + $0x72c] ss:$16 sps:$4 sm:$0xff]   ;;  %v4571_v3 = vld [vmem:[#allocation6 + $0x528] ss:$16 sps:$4 sm:$0xff]  }
 0x1be   :  { %2986 = vmatmul.mubr.bf16.vlgmr.msra.gmra.mxu0 %v4873_v55  ;;  %v4502_v55 = vld [vmem:[#allocation6 + $0x6a8] ss:$16 sps:$4 sm:$0xff]  }
 0x1bf   :  { %3029 = vmatmul.mubr.bf16.vlgmr.msra.gmra.mxu1 %v4877_v60  ;;  %3040 = vmatpush1.bf16.msra.mxu0 %v4487_v4  ;;  %v4510_v60 = vld [vmem:[#allocation6 + $0x68c] ss:$16 sps:$4 sm:$0xff]   ;;  %v4574_v4 = vld [vmem:[#allocation6 + $0x728] ss:$16 sps:$4 sm:$0xff]  }
 0x1c0   :  { %3071 = vmatprep.mubr.bf16.mxu0 %v4895_v59  ;;  %3083 = vmatpush1.bf16.msra.mxu1 %v4490_v5  ;;  %v4508_v59 = vld [vmem:[#allocation6 + $0x688] ss:$16 sps:$4 sm:$0xff]   ;;  %v4579_v5 = vld [vmem:[#allocation6 + $0x50c] ss:$16 sps:$4 sm:$0xff]  }
 0x1c1   :  { %3114 = vmatprep.mubr.bf16.mxu1 %v4900_v52  ;;  %3041 = vmatprep.subr.bf16.mxu0 %v4495_v50  ;;  %v4511_v52 = vld [vmem:[#allocation6 + $0x468] ss:$16 sps:$4 sm:$0xff]   ;;  %v4582_v50 = vld [vmem:[#allocation6 + $0x70c] ss:$16 sps:$4 sm:$0xff]  }
 0x1c2   :  { %3084 = vmatprep.subr.bf16.mxu1 %v4498_v6  ;;  %v4577_v6 = vld [vmem:[#allocation6 + $0x508] ss:$16 sps:$4 sm:$0xff]  }
 0x1c3   :  { %3042 = vmatpush1.bf16.msra.mxu0 %v4493_v7  ;;  %v4580_v7 = vld [vmem:[#allocation6 + $0x708] ss:$16 sps:$4 sm:$0xff]  }
 0x1c4   :  { %3085 = vmatpush1.bf16.msra.mxu1 %v4496_v56  ;;  %3043 = vmatprep.subr.bf16.mxu0 %v4501_v8  ;;  %v4585_v56 = vld [vmem:[#allocation8 + $0x74] ss:$8 sps:$4 sm:$0xff]   ;;  %v4583_v8 = vld [vmem:[#allocation8 + $0x70] ss:$8 sps:$4 sm:$0xff]  }
 0x1c5   :  { %3086 = vmatprep.subr.bf16.mxu1 %v4504_v9  ;;  %v4588_v9 = vld [vmem:[#allocation8 + $0x64] ss:$8 sps:$4 sm:$0xff]  }
 0x1c7   :  { %3044 = vmatpush1.bf16.msra.mxu0 %v4499_v10  ;;  %v4586_v10 = vld [vmem:[#allocation8 + $0x60] ss:$8 sps:$4 sm:$0xff]  }
 0x1c8   :  { %3087 = vmatpush1.bf16.msra.mxu1 %v4502_v55  ;;  %3045 = vmatprep.subr.bf16.mxu0 %v4507_v11  ;;  %v4591_v55 = vld [vmem:[#allocation8 + $0x54] ss:$8 sps:$4 sm:$0xff]   ;;  %v4589_v11 = vld [vmem:[#allocation8 + $0x50] ss:$8 sps:$4 sm:$0xff]  }
 0x1c9   :  { %3088 = vmatprep.subr.bf16.mxu1 %v4510_v60  ;;  %v4594_v60 = vld [vmem:[#allocation8 + $0x44] ss:$8 sps:$4 sm:$0xff]  }
 0x1cb   :  { %3046 = vmatpush1.bf16.msra.mxu0 %v4505_v19  ;;  %v4592_v19 = vld [vmem:[#allocation8 + $0x40] ss:$8 sps:$4 sm:$0xff]  }
 0x1cc   :  { %3089 = vmatpush1.bf16.msra.mxu1 %v4508_v59  ;;  %3047 = vmatprep.subr.bf16.mxu0 %v4513_v20  ;;  %v4631_v59 = vld [vmem:[#allocation8 + $0x170] ss:$8 sps:$4 sm:$0xff]   ;;  %v4633_v20 = vld [vmem:[#allocation8 + $0x174] ss:$8 sps:$4 sm:$0xff]  }
 0x1cd   :  { %3090 = vmatprep.subr.bf16.mxu1 %v4516_v21  ;;  %v4597_v21 = vld [vmem:[#allocation8 + $0x34] ss:$8 sps:$4 sm:$0xff]  }
 0x1cf   :  { %3048 = vmatpush1.bf16.msra.mxu0 %v4511_v52  ;;  %v4636_v52 = vld [vmem:[#allocation8 + $0x164] ss:$8 sps:$4 sm:$0xff]  }
 0x1d0   :  { %3091 = vmatpush1.bf16.msra.mxu1 %v4514_v22  ;;  %3049 = vmatprep.subr.bf16.mxu0 %v4519_v23  ;;  %v4639_v22 = vld [vmem:[#allocation8 + $0x154] ss:$8 sps:$4 sm:$0xff]   ;;  %v4600_v23 = vld [vmem:[#allocation8 + $0x24] ss:$8 sps:$4 sm:$0xff]  }
 0x1d1   :  { %3092 = vmatprep.subr.bf16.mxu1 %v4522_v14  ;;  %v4637_v14 = vld [vmem:[#allocation8 + $0x150] ss:$8 sps:$4 sm:$0xff]  }
 0x1d3   :  { %3050 = vmatpush1.bf16.msra.mxu0 %v4517_v24  ;;  %v4598_v24 = vld [vmem:[#allocation8 + $0x20] ss:$8 sps:$4 sm:$0xff]  }
 0x1d4   :  { %3093 = vmatpush1.bf16.msra.mxu1 %v4520_v25  ;;  %3051 = vmatprep.subr.bf16.mxu0 %v4525_v15  ;;  %v4642_v25 = vld [vmem:[#allocation8 + $0x144] ss:$8 sps:$4 sm:$0xff]   ;;  %v4603_v15 = vld [vmem:[#allocation8 + $0x14] ss:$8 sps:$4 sm:$0xff]  }
 0x1d5   :  { %3094 = vmatprep.subr.bf16.mxu1 %v4528_v26  ;;  %v4640_v26 = vld [vmem:[#allocation8 + $0x140] ss:$8 sps:$4 sm:$0xff]  }
 0x1d7   :  { %3052 = vmatpush1.bf16.msra.mxu0 %v4523_v27  ;;  %v4601_v27 = vld [vmem:[#allocation8 + $0x10] ss:$8 sps:$4 sm:$0xff]  }
 0x1d8   :  { %3095 = vmatpush1.bf16.msra.mxu1 %v4526_v28  ;;  %3053 = vmatprep.subr.bf16.mxu0 %v4531_v29  ;;  %v4645_v28 = vld [vmem:[#allocation8 + $0x134] ss:$8 sps:$4 sm:$0xff]   ;;  %v4606_v29 = vld [vmem:[#allocation8 + $0x4] ss:$8 sps:$4 sm:$0xff]  }
 0x1d9   :  { %3096 = vmatprep.subr.bf16.mxu1 %v4534_v30  ;;  %v4643_v30 = vld [vmem:[#allocation8 + $0x130] ss:$8 sps:$4 sm:$0xff]  }
 0x1db   :  { %3054 = vmatpush1.bf16.msra.mxu0 %v4529_v31  ;;  %v4604_v31 = vld [vmem:[#allocation8] ss:$8 sps:$4 sm:$0xff]  }
 0x1dc   :  { %3097 = vmatpush1.bf16.msra.mxu1 %v4532_v32  ;;  %3055 = vmatprep.subr.bf16.mxu0 %v4537_v33  ;;  %v4648_v32 = vld [vmem:[#allocation8 + $0x124] ss:$8 sps:$4 sm:$0xff]   ;;  %v4609_v33 = vld [vmem:[#allocation8 + $0xf4] ss:$8 sps:$4 sm:$0xff]  }
 0x1dd   :  { %3098 = vmatprep.subr.bf16.mxu1 %v4540_v34  ;;  %v4646_v34 = vld [vmem:[#allocation8 + $0x120] ss:$8 sps:$4 sm:$0xff]  }
 0x1df   :  { %3056 = vmatpush2.bf16.msra.mxu0 %v4535_v35  ;;  %v4607_v35 = vld [vmem:[#allocation8 + $0xf0] ss:$8 sps:$4 sm:$0xff]  }
 0x1e0   :  { %3099 = vmatpush2.bf16.msra.mxu1 %v4538_v36  ;;  %3057 = vmatprep.subr.bf16.mxu0 %v4543_v37  ;;  %v4651_v36 = vld [vmem:[#allocation8 + $0x114] ss:$8 sps:$4 sm:$0xff]   ;;  %v4612_v37 = vld [vmem:[#allocation8 + $0xe4] ss:$8 sps:$4 sm:$0xff]  }
 0x1e1   :  { %3100 = vmatprep.subr.bf16.mxu1 %v4546_v38  ;;  %v4649_v38 = vld [vmem:[#allocation8 + $0x110] ss:$8 sps:$4 sm:$0xff]  }
 0x1e3   :  { %3058 = vmatpush2.bf16.msra.mxu0 %v4541_v39  ;;  %v4610_v39 = vld [vmem:[#allocation8 + $0xe0] ss:$8 sps:$4 sm:$0xff]  }
 0x1e4   :  { %3101 = vmatpush2.bf16.msra.mxu1 %v4544_v40  ;;  %3059 = vmatprep.subr.bf16.mxu0 %v4549_v41  ;;  %v4654_v40 = vld [vmem:[#allocation8 + $0x104] ss:$8 sps:$4 sm:$0xff]   ;;  %v4615_v41 = vld [vmem:[#allocation8 + $0xd4] ss:$8 sps:$4 sm:$0xff]  }
 0x1e5   :  { %3102 = vmatprep.subr.bf16.mxu1 %v4552_v42  ;;  %v4652_v42 = vld [vmem:[#allocation8 + $0x100] ss:$8 sps:$4 sm:$0xff]  }
 0x1e7   :  { %3060 = vmatpush2.bf16.msra.mxu0 %v4547_v43  ;;  %v4613_v43 = vld [vmem:[#allocation8 + $0xd0] ss:$8 sps:$4 sm:$0xff]  }
 0x1e8   :  { %3103 = vmatpush2.bf16.msra.mxu1 %v4550_v44  ;;  %3061 = vmatprep.subr.bf16.mxu0 %v4555_v45  ;;  %v4657_v44 = vld [vmem:[#allocation8 + $0x1f4] ss:$8 sps:$4 sm:$0xff]   ;;  %v4618_v45 = vld [vmem:[#allocation8 + $0xc4] ss:$8 sps:$4 sm:$0xff]  }
 0x1e9   :  { %3104 = vmatprep.subr.bf16.mxu1 %v4558_v46  ;;  %v4655_v46 = vld [vmem:[#allocation8 + $0x1f0] ss:$8 sps:$4 sm:$0xff]  }
 0x1eb   :  { %3062 = vmatpush2.bf16.msra.mxu0 %v4553_v47  ;;  %v4616_v47 = vld [vmem:[#allocation8 + $0xc0] ss:$8 sps:$4 sm:$0xff]  }
 0x1ec   :  { %3105 = vmatpush2.bf16.msra.mxu1 %v4556_v48  ;;  %3063 = vmatprep.subr.bf16.mxu0 %v4561_v49  ;;  %v4660_v48 = vld [vmem:[#allocation8 + $0x1e4] ss:$8 sps:$4 sm:$0xff]   ;;  %v4621_v49 = vld [vmem:[#allocation8 + $0xb4] ss:$8 sps:$4 sm:$0xff]  }
 0x1ed   :  { %3106 = vmatprep.subr.bf16.mxu1 %v4564_v53  ;;  %v4658_v53 = vld [vmem:[#allocation8 + $0x1e0] ss:$8 sps:$4 sm:$0xff]  }
 0x1ef   :  { %3064 = vmatpush2.bf16.msra.mxu0 %v4559_v57  ;;  %v4619_v57 = vld [vmem:[#allocation8 + $0xb0] ss:$8 sps:$4 sm:$0xff]  }
 0x1f0   :  { %3107 = vmatpush2.bf16.msra.mxu1 %v4562_v58  ;;  %3065 = vmatprep.subr.bf16.mxu0 %v4567_v61  ;;  %v4663_v58 = vld [vmem:[#allocation8 + $0x1d4] ss:$8 sps:$4 sm:$0xff]   ;;  %v4624_v61 = vld [vmem:[#allocation8 + $0xa4] ss:$8 sps:$4 sm:$0xff]  }
 0x1f1   :  { %3108 = vmatprep.subr.bf16.mxu1 %v4570_v62  ;;  %v4661_v62 = vld [vmem:[#allocation8 + $0x1d0] ss:$8 sps:$4 sm:$0xff]  }
 0x1f3   :  { %3066 = vmatpush2.bf16.msra.mxu0 %v4565_v63  ;;  %v4622_v63 = vld [vmem:[#allocation8 + $0xa0] ss:$8 sps:$4 sm:$0xff]  }
 0x1f4   :  { %3109 = vmatpush2.bf16.msra.mxu1 %v4568_v0  ;;  %3067 = vmatprep.subr.bf16.mxu0 %v4573_v1  ;;  %v4666_v0 = vld [vmem:[#allocation8 + $0x1c4] ss:$8 sps:$4 sm:$0xff]  }
 0x1f5   :  { %3110 = vmatprep.subr.bf16.mxu1 %v4576_v2  ;;  %v4627_v2 = vld [vmem:[#allocation8 + $0x94] ss:$8 sps:$4 sm:$0xff]  }
 0x1f7   :  { %3068 = vmatpush2.bf16.msra.mxu0 %v4571_v3 }
 0x1f8   :  { %3111 = vmatpush2.bf16.msra.mxu1 %v4574_v4  ;;  %3069 = vmatprep.subr.bf16.mxu0 %v4579_v5  ;;  %v4664_v4 = vld [vmem:[#allocation8 + $0x1c0] ss:$8 sps:$4 sm:$0xff]   ;;  %v4625_v5 = vld [vmem:[#allocation8 + $0x90] ss:$8 sps:$4 sm:$0xff]  }
 0x1f9   :  { %3112 = vmatprep.subr.bf16.mxu1 %v4582_v50  ;;  %v4919_v50 = vld [vmem:[%s4948_s4] sm:$0xf] }
 0x1fb   :  { %3070 = vmatpush2.bf16.msra.mxu0 %v4577_v6 }
 0x1fc   :  { %3113 = vmatpush2.bf16.msra.mxu1 %v4580_v7  ;;  %3549 = vmatprep.subr.bf16.mxu0 %v4585_v56  ;;  %v4630_v7 = vld [vmem:[#allocation8 + $0x84] ss:$8 sps:$4 sm:$0xff]  }
 0x1fd   :  { %3592 = vmatprep.subr.bf16.mxu1 %v4633_v20 }
 0x1fe   :  { %3072 = vmatmul.mubr.bf16.vlgmr.msra.gmra.mxu0 %v4898_v51  ;;  %v4634_v51 = vld [vmem:[#allocation8 + $0x160] ss:$8 sps:$4 sm:$0xff]   ;;  %v2815_v1 = vpop.f32.mrf.mxu0 }
 0x1ff   :  { %3115 = vmatmul.mubr.bf16.vlgmr.msra.gmra.mxu1 %v4902_v54  ;;  %3550 = vmatpush1.bf16.msra.mxu0 %v4583_v8  ;;  %v4595_v54 = vld [vmem:[#allocation8 + $0x30] ss:$8 sps:$4 sm:$0xff]   ;;  %v2858_v3 = vpop.f32.mrf.mxu1  ;;  %v1484_v8 = vrot.slane %v4919_v50, %v4847_v13 }
 0x200   :  { %3551 = vmatprep.subr.bf16.mxu0 %v4588_v9  ;;  %3593 = vmatpush1.bf16.msra.mxu1 %v4631_v59  ;;  %v2817_v6 = vpop.f32.mrf.mxu0  ;;  %v1488_v9 = vrot.slane %v4919_v50, %v4855_v16 }
 0x201   :  { %3594 = vmatprep.subr.bf16.mxu1 %v4636_v52  ;;  %v2860_v56 = vpop.f32.mrf.mxu1 }
 0x203   :  { %3552 = vmatpush1.bf16.msra.mxu0 %v4586_v10  ;;  %v4628_v10 = vld [vmem:[#allocation8 + $0x80] ss:$8 sps:$4 sm:$0xff]  }
 0x204   :  { %3553 = vmatprep.subr.bf16.mxu0 %v4591_v55  ;;  %3595 = vmatpush1.bf16.msra.mxu1 %v4634_v51  ;;  %v2819_v55 = vpop.f32.mrf.mxu0 }
 0x205   :  { %3596 = vmatprep.subr.bf16.mxu1 %v4639_v22  ;;  %v2820_v20 = vadd.f32 %v2819_v55, %v1484_v8 }
 0x206   :  { %v2821_v59 = vpop.f32.mrf.mxu0 }
 0x207   :  { %3554 = vmatpush1.bf16.msra.mxu0 %v4589_v11  ;;  %v2862_v11 = vpop.f32.mrf.mxu1 }
 0x208   :  { %3555 = vmatprep.subr.bf16.mxu0 %v4594_v60  ;;  %3597 = vmatpush1.bf16.msra.mxu1 %v4637_v14  ;;  %v2816_v60 = vadd.f32 %v2815_v1, %v1484_v8  ;;  %v2822_v14 = vadd.f32 %v2821_v59, %v1488_v9 }
 0x209   :  { %3598 = vmatprep.subr.bf16.mxu1 %v4642_v25  ;;  %v4667_v25 = vld [vmem:[#allocation8 + $0x1b0] ss:$8 sps:$4 sm:$0xff]  }
 0x20a   :  { %v2859_v51 = vadd.f32 %v2858_v3, %v2816_v60 }
 0x20b   :  { %3556 = vmatpush1.bf16.msra.mxu0 %v4592_v19  ;;  %v2818_v19 = vadd.f32 %v2817_v6, %v1488_v9 }
 0x20c   :  { %3557 = vmatprep.subr.bf16.mxu0 %v4597_v21  ;;  %3599 = vmatpush1.bf16.msra.mxu1 %v4640_v26  ;;  %v2864_v21 = vpop.f32.mrf.mxu1 }
 0x20d   :  { %3600 = vmatprep.subr.bf16.mxu1 %v4645_v28 }
 0x20f   :  { %3558 = vmatpush1.bf16.msra.mxu0 %v4595_v54  ;;  %v2861_v54 = vadd.f32 %v2860_v56, %v2818_v19 }
 0x210   :  { %3559 = vmatprep.subr.bf16.mxu0 %v4600_v23  ;;  %3601 = vmatpush1.bf16.msra.mxu1 %v4643_v30  ;;  %v4669_v23 = vld [vmem:[#allocation8 + $0x1b4] ss:$8 sps:$4 sm:$0xff]  }
 0x211   :  { %3602 = vmatprep.subr.bf16.mxu1 %v4648_v32  ;;  %v4672_v32 = vld [vmem:[#allocation8 + $0x1a4] ss:$8 sps:$4 sm:$0xff]  }
 0x213   :  { %3560 = vmatpush1.bf16.msra.mxu0 %v4598_v24 }
 0x214   :  { %3561 = vmatprep.subr.bf16.mxu0 %v4603_v15  ;;  %3603 = vmatpush1.bf16.msra.mxu1 %v4646_v34  ;;  %v2863_v15 = vadd.f32 %v2862_v11, %v2820_v20 }
 0x215   :  { %3604 = vmatprep.subr.bf16.mxu1 %v4651_v36  ;;  %v4670_v36 = vld [vmem:[#allocation8 + $0x1a0] ss:$8 sps:$4 sm:$0xff]  }
 0x217   :  { %3562 = vmatpush1.bf16.msra.mxu0 %v4601_v27 }
 0x218   :  { %3563 = vmatprep.subr.bf16.mxu0 %v4606_v29  ;;  %3605 = vmatpush1.bf16.msra.mxu1 %v4649_v38 }
 0x219   :  { %3606 = vmatprep.subr.bf16.mxu1 %v4654_v40 }
 0x21b   :  { %3564 = vmatpush1.bf16.msra.mxu0 %v4604_v31 }
 0x21c   :  { %3565 = vmatprep.subr.bf16.mxu0 %v4609_v33  ;;  %3607 = vmatpush1.bf16.msra.mxu1 %v4652_v42  ;;  %v2865_v33 = vadd.f32 %v2864_v21, %v2822_v14  ;;  %v4675_v42 = vld [vmem:[#allocation8 + $0x194] ss:$8 sps:$4 sm:$0xff]  }
 0x21d   :  { %3608 = vmatprep.subr.bf16.mxu1 %v4657_v44 }
 0x21f   :  { %3566 = vmatpush2.bf16.msra.mxu0 %v4607_v35 }
 0x220   :  { %3567 = vmatprep.subr.bf16.mxu0 %v4612_v37  ;;  %3609 = vmatpush2.bf16.msra.mxu1 %v4655_v46 }
 0x221   :  { %3610 = vmatprep.subr.bf16.mxu1 %v4660_v48  ;;  %v4676_v48 = vld [vmem:[#allocation8 + $0x180] ss:$8 sps:$4 sm:$0xff]  }
 0x223   :  { %3568 = vmatpush2.bf16.msra.mxu0 %v4610_v39 }
 0x224   :  { %3569 = vmatprep.subr.bf16.mxu0 %v4615_v41  ;;  %3611 = vmatpush2.bf16.msra.mxu1 %v4658_v53  ;;  %v4678_v53 = vld [vmem:[#allocation8 + $0x184] ss:$8 sps:$4 sm:$0xff]  }
 0x225   :  { %3612 = vmatprep.subr.bf16.mxu1 %v4663_v58 }
 0x227   :  { %3570 = vmatpush2.bf16.msra.mxu0 %v4613_v43 }
 0x228   :  { %3571 = vmatprep.subr.bf16.mxu0 %v4618_v45  ;;  %3613 = vmatpush2.bf16.msra.mxu1 %v4661_v62  ;;  %v4673_v45 = vld [vmem:[#allocation8 + $0x190] ss:$8 sps:$4 sm:$0xff]  }
 0x229   :  { %3614 = vmatprep.subr.bf16.mxu1 %v4666_v0 }
 0x22b   :  { %3572 = vmatpush2.bf16.msra.mxu0 %v4616_v47 }
 0x22c   :  { %3573 = vmatprep.subr.bf16.mxu0 %v4621_v49  ;;  %3615 = vmatpush2.bf16.msra.mxu1 %v4664_v4  ;;  %v1492_v4 = vrot.slane %v4919_v50, %v1121_v18 }
 0x22d   :  { %3616 = vmatprep.subr.bf16.mxu1 %v4669_v23 }
 0x22f   :  { %3574 = vmatpush2.bf16.msra.mxu0 %v4619_v57 }
 0x230   :  { %3575 = vmatprep.subr.bf16.mxu0 %v4624_v61  ;;  %3617 = vmatpush2.bf16.msra.mxu1 %v4667_v25 }
 0x231   :  { %3618 = vmatprep.subr.bf16.mxu1 %v4672_v32 }
 0x233   :  { %3576 = vmatpush2.bf16.msra.mxu0 %v4622_v63 }
 0x234   :  { %3577 = vmatprep.subr.bf16.mxu0 %v4627_v2  ;;  %3619 = vmatpush2.bf16.msra.mxu1 %v4670_v36 }
 0x235   :  { %3620 = vmatprep.subr.bf16.mxu1 %v4675_v42 }
 0x237   :  { %3578 = vmatpush2.bf16.msra.mxu0 %v4625_v5  ;;  %v1496_v5 = vrot.slane %v4919_v50, %v1125_v17 }
 0x238   :  { %3579 = vmatprep.subr.bf16.mxu0 %v4630_v7  ;;  %3621 = vmatpush2.bf16.msra.mxu1 %v4673_v45 }
 0x239   :  { %3622 = vmatprep.subr.bf16.mxu1 %v4678_v53 }
 0x23b   :  { %3580 = vmatpush2.bf16.msra.mxu0 %v4628_v10 }
 0x23c   :  { %3623 = vmatpush2.bf16.msra.mxu1 %v4676_v48  ;;  %v4757_v48 = vmov 0  }
 0x23d   :  { %4198 = vset.pattern.permute.xlu0 %v4757_v48 }
 0x23e   :  { %v2901_v52 = vpop.f32.mrf.mxu0 }
 0x23f   :  { %v2944_v22 = vpop.f32.mrf.mxu1  ;;  %v2902_v26 = vadd.f32 %v2901_v52, %v2859_v51 }
 0x240   :  { %v2903_v24 = vpop.f32.mrf.mxu0 }
 0x241   :  { %v2904_v27 = vadd.f32 %v2903_v24, %v2861_v54  ;;  %v2946_v28 = vpop.f32.mrf.mxu1  ;;  %v2945_v37 = vadd.f32 %v2944_v22, %v2902_v26 }
 0x242   :  { %v2905_v29 = vpop.f32.mrf.mxu0 }
 0x243   :  { %v2906_v30 = vadd.f32 %v2905_v29, %v2863_v15  ;;  %v2948_v31 = vpop.f32.mrf.mxu1  ;;  %v2947_v34 = vadd.f32 %v2946_v28, %v2904_v27  ;;  %v3133_v46 = vmul.f32 0.2, %v2945_v37  ;;  %vm3125_vm2 = vcmp.gt.f32.partialorder %v2945_v37, 0.0 }
 0x244   :  { %v2907_v35 = vpop.f32.mrf.mxu0 }
 0x245   :  { %v2949_v38 = vadd.f32 %v2948_v31, %v2906_v30  ;;  %v2908_v39 = vadd.f32 %v2907_v35, %v2865_v33  ;;  %v2950_v41 = vpop.f32.mrf.mxu1  ;;  %v3134_v43 = vmul.f32 0.2, %v2947_v34  ;;  %vm3126_vm1 = vcmp.gt.f32.partialorder %v2947_v34, 0.0 }
 0x246   :  { %v3141_v61 = vsel %vm3125_vm2, %v2945_v37, %v3133_v46 }
 0x247   :  { %v3137_v40 = vmul.f32 0.2, %v2949_v38  ;;  %vm3129_vm0 = vcmp.gt.f32.partialorder %v2949_v38, 0.0  ;;  %v2951_v44 = vadd.f32 %v2950_v41, %v2908_v39  ;;  %v3142_v57 = vsel %vm3126_vm1, %v2947_v34, %v3134_v43 }
 0x248   :  { %v4756_v39 = vmov 1966171168   ;;  %v4186_v41 = vld.sshfl [vmem:[%s4951_s7] sm:$0x11 pattern:$0x75316420] }
 0x249   :  { %vm3130_vm3 = vcmp.gt.f32.partialorder %v2951_v44, 0.0  ;;  %v3138_v47 = vmul.f32 0.2, %v2951_v44  ;;  %v3145_v49 = vsel %vm3129_vm0, %v2949_v38, %v3137_v40  ;;  %v3670_v40 = vunpack.c.l.s4 %v4756_v39 }
 0x24a   :  { %v3149_v63 = vpack.c.bf16 %v3145_v49, %v3141_v61  ;;  %v3668_v42 = vcombine.high %v4186_v41, %v4186_v41 }
 0x24b   :  { %v3146_v58 = vsel %vm3130_vm3, %v2951_v44, %v3138_v47  ;;  %v3671_v43 = vunpack.c.0.s8 %v3670_v40  ;;  %v3650_v47 = vld [vmem:[#allocation3] sm:$0x1] }
 0x24c   :  { %v3150_v62 = vpack.c.bf16 %v3146_v58, %v3142_v57  ;;  %3653 = vperm.xlu0 %4198, %v3650_v47   ;;  %v3217_v57 = vld [vmem:[%s4950_s6] sm:$0x3] }
 0x24d   :  { %v3674_v44 = vsub.s32 %v3671_v43, %v4844_v12  ;;  %v3226_v58 = vrot.slane %v3217_v57, %v4855_v16  ;;  %v3222_v61 = vrot.slane %v3217_v57, %v4847_v13 }
 0x24e   :  { %3581 = vmatprep.mubr.bf16.mxu0 %v3150_v62 }
 0x24f   :  { %3582 = vmatmul.mubr.bf16.vlgmr.msra.gmra.mxu0 %v3149_v63  ;;  %v3682_v45 = vrot.slane %v3668_v42, %v3674_v44  ;;  %v3675_v46 = vrot.slane %v4186_v41, %v3674_v44 }
 0x251   :  { %3717 = vmatprep.mubr.bf16.mxu0 %v3682_v45 }
 0x27e   :  { %v2987_v0 = vpop.f32.mrf.mxu0 }
 0x27f   :  { %v3030_v1 = vpop.f32.mrf.mxu1  ;;  %v2988_v56 = vadd.f32 %v2987_v0, %v1492_v4 }
 0x280   :  { %v2989_v2 = vpop.f32.mrf.mxu0 }
 0x281   :  { %v3032_v3 = vpop.f32.mrf.mxu1  ;;  %v2990_v8 = vadd.f32 %v2989_v2, %v1496_v5  ;;  %v3031_v60 = vadd.f32 %v3030_v1, %v2988_v56 }
 0x282   :  { %v2991_v6 = vpop.f32.mrf.mxu0 }
 0x283   :  { %v3034_v7 = vpop.f32.mrf.mxu1  ;;  %v2992_v10 = vadd.f32 %v2991_v6, %v1492_v4  ;;  %v3033_v19 = vadd.f32 %v3032_v3, %v2990_v8 }
 0x284   :  { %v2993_v9 = vpop.f32.mrf.mxu0 }
 0x285   :  { %v3036_v55 = vpop.f32.mrf.mxu1  ;;  %v2994_v20 = vadd.f32 %v2993_v9, %v1496_v5  ;;  %v3035_v52 = vadd.f32 %v3034_v7, %v2992_v10 }
 0x287   :  { %v3037_v50 = vadd.f32 %v3036_v55, %v2994_v20 }
 0x2be   :  { %v3073_v11 = vpop.f32.mrf.mxu0 }
 0x2bf   :  { %v3116_v59 = vpop.f32.mrf.mxu1  ;;  %v3074_v51 = vadd.f32 %v3073_v11, %v3031_v60 }
 0x2c0   :  { %v3075_v21 = vpop.f32.mrf.mxu0 }
 0x2c1   :  { %v3076_v18 = vadd.f32 %v3075_v21, %v3033_v19  ;;  %v3118_v54 = vpop.f32.mrf.mxu1  ;;  %v3117_v25 = vadd.f32 %v3116_v59, %v3074_v51 }
 0x2c2   :  { %v3077_v22 = vpop.f32.mrf.mxu0 }
 0x2c3   :  { %v3078_v23 = vadd.f32 %v3077_v22, %v3035_v52  ;;  %v3120_v17 = vpop.f32.mrf.mxu1  ;;  %v3119_v14 = vadd.f32 %v3118_v54, %v3076_v18  ;;  %v3135_v31 = vmul.f32 0.2, %v3117_v25  ;;  %vm3127_vm6 = vcmp.gt.f32.partialorder %v3117_v25, 0.0 }
 0x2c4   :  { %v3079_v24 = vpop.f32.mrf.mxu0 }
 0x2c5   :  { %v3121_v15 = vadd.f32 %v3120_v17, %v3078_v23  ;;  %v3080_v26 = vadd.f32 %v3079_v24, %v3037_v50  ;;  %v3122_v28 = vpop.f32.mrf.mxu1  ;;  %v3136_v29 = vmul.f32 0.2, %v3119_v14  ;;  %vm3128_vm5 = vcmp.gt.f32.partialorder %v3119_v14, 0.0 }
 0x2c6   :  { %v3143_v36 = vsel %vm3127_vm6, %v3117_v25, %v3135_v31 }
 0x2c7   :  { %v3139_v27 = vmul.f32 0.2, %v3121_v15  ;;  %vm3131_vm4 = vcmp.gt.f32.partialorder %v3121_v15, 0.0  ;;  %v3123_v30 = vadd.f32 %v3122_v28, %v3080_v26  ;;  %v3144_v34 = vsel %vm3128_vm5, %v3119_v14, %v3136_v29  ;;  %v3654_v51 = vpop.permute.xlu0 %3653 }
 0x2c8   :  { %v3659_v18 = vrot.slane %v3654_v51, %v4847_v13 }
 0x2c9   :  { %vm3132_vm7 = vcmp.gt.f32.partialorder %v3123_v30, 0.0  ;;  %v3140_v32 = vmul.f32 0.2, %v3123_v30  ;;  %v3147_v33 = vsel %vm3131_vm4, %v3121_v15, %v3139_v27 }
 0x2ca   :  { %v3151_v38 = vpack.c.bf16 %v3147_v33, %v3143_v36 }
 0x2cb   :  { %v3148_v35 = vsel %vm3132_vm7, %v3123_v30, %v3140_v32 }
 0x2cc   :  { %v3152_v37 = vpack.c.bf16 %v3148_v35, %v3144_v34 }
 0x2ce   :  { %3624 = vmatprep.mubr.bf16.mxu1 %v3152_v37 }
 0x2cf   :  { %3625 = vmatmul.mubr.bf16.vlgmr.msra.gmra.mxu1 %v3151_v38 }
 0x30f   :  { %v3583_v49 = vpop.f32.mrf.mxu0 }
 0x310   :  { %v3584_v0 = vadd.f32 %v3583_v49, %v3222_v61 }
 0x311   :  { %v3585_v53 = vpop.f32.mrf.mxu0 }
 0x312   :  { %v3586_v12 = vadd.f32 %v3585_v53, %v3226_v58 }
 0x313   :  { %v3587_v62 = vpop.f32.mrf.mxu0 }
 0x314   :  { %v3588_v3 = vadd.f32 %v3587_v62, %v3222_v61 }
 0x315   :  { %v3589_v1 = vpop.f32.mrf.mxu0 }
 0x316   :  { %v3590_v7 = vadd.f32 %v3589_v1, %v3226_v58 }
 0x38f   :  { %v3626_v63 = vpop.f32.mrf.mxu1 }
 0x390   :  { %v3627_v5 = vadd.f32 %v3626_v63, %v3584_v0 }
 0x391   :  { %v3628_v2 = vpop.f32.mrf.mxu1 }
 0x392   :  { %v3629_v4 = vadd.f32 %v3628_v2, %v3586_v12  ;;  %v3639_v16 = vmul.f32 0.2, %v3627_v5  ;;  %vm3635_vm10 = vcmp.gt.f32.partialorder %v3627_v5, 0.0 }
 0x393   :  { %v3630_v6 = vpop.f32.mrf.mxu1 }
 0x394   :  { %v3631_v56 = vadd.f32 %v3630_v6, %v3588_v3  ;;  %v3640_v9 = vmul.f32 0.2, %v3629_v4  ;;  %vm3636_vm9 = vcmp.gt.f32.partialorder %v3629_v4, 0.0  ;;  %v3643_v20 = vsel %vm3635_vm10, %v3627_v5, %v3639_v16 }
 0x395   :  { %v3632_v8 = vpop.f32.mrf.mxu1 }
 0x396   :  { %vm3637_vm8 = vcmp.gt.f32.partialorder %v3631_v56, 0.0  ;;  %v3641_v10 = vmul.f32 0.2, %v3631_v56  ;;  %v3633_v55 = vadd.f32 %v3632_v8, %v3590_v7  ;;  %v3644_v19 = vsel %vm3636_vm9, %v3629_v4, %v3640_v9 }
 0x398   :  { %vm3638_vm11 = vcmp.gt.f32.partialorder %v3633_v55, 0.0  ;;  %v3642_v11 = vmul.f32 0.2, %v3633_v55  ;;  %v3645_v60 = vsel %vm3637_vm8, %v3631_v56, %v3641_v10 }
 0x399   :  { %v3648_v52 = vpack.c.bf16 %v3645_v60, %v3643_v20 }
 0x39a   :  { %v3646_v59 = vsel %vm3638_vm11, %v3633_v55, %v3642_v11 }
 0x39b   :  { %v3649_v21 = vpack.c.bf16 %v3646_v59, %v3644_v19 }
 0x39d   :  { %3699 = vmatprep.subr.bf16.mxu0 %v3649_v21 }
 0x39e   :  { %3700 = vmatpush1.bf16.xpose.msra.mxu0 %v3648_v52 }
 0x3a5   :  { %3718 = vmatmul.mubr.bf16.vlgmr.msra.gmra.mxu0 %v3675_v46 }
 0x465   :  { %v3719_v54 = vpop.f32.mrf.mxu0 }
 0x466   :  { %v3720_v22 = vadd.f32 %v3719_v54, %v3659_v18 }
 0x467   :  { %v3721_v23 = vpop.f32.mrf.mxu0 }
 0x468   :  { %v3725_v17 = vsub.f32 0.0, %v3720_v22 }
 0x469   :  { %v3722_v50 = vpop.f32.mrf.mxu0 }
 0x46a   :  { %v3726_v14 = vmul.f32 1.442695, %v3725_v17 }
 0x46b   :  { %v3723_v24 = vpop.f32.mrf.mxu0 }
 0x46c   :  { %4679 = vpow2.f32 %v3726_v14 }
 0x479   :  { %v4680_v25 = vpop.eup %4679 }
 0x47a   :  { %v3728_v15 = vadd.f32 1.0, %v4680_v25 }
 0x47c   :  { %4681 = vrcp.f32 %v3728_v15 }
 0x489   :  { %v4682_v26 = vpop.eup %4681 }
 0x48a   :  { %3731 = vst.msk [vmem:[%s4953_s9] sm:$0x1] %vm3730_vm12, %v4682_v26 }
 0x48b   :  { %3736 = vsyncpa [#allocation5], 1 }
 0x48c   :  { %3737 = vsyncpa [#allocation7], 1 }

</bundles_post_ra>
